<compile_context>
chip_gen: v5e
topology: v5e:2x2
jax: 0.10.0
libtpu: 0.0.40
codegen_flags: <defaults>
</compile_context>

<pallas_src>
import functools

import numpy as np
import jax
import jax.numpy as jnp
from jax.experimental import pallas as pl
from jax.experimental.pallas import tpu as pltpu

EPS = 1e-5
LANE = 128
TM_MAX = 512                        # rows per M-tile (multiple of 8)
VMEM_LIMIT = 48 * 1024 * 1024       # fits v7x (64 MiB) as well as v5e/v6e


def _round_up(x, m):
    return (x + m - 1) // m * m


def _choose_tm(m_true):
    return min(TM_MAX, _round_up(max(m_true, 1), 8))


def _pad_axis(x, size, axis):
    pad = size - x.shape[axis]
    if pad == 0:
        return x
    widths = [(0, 0)] * x.ndim
    widths[axis] = (0, pad)
    return jnp.pad(x, widths)


# ---------------------------------------------------------------------------
# Pallas kernels
# ---------------------------------------------------------------------------
def _mm_stats_kernel(p_ref, w_ref, y_ref, stats_ref):
    """y = P @ W (bf16 in, f32 acc) + per-tile sum / sum-of-squares side output."""
    y = jnp.dot(p_ref[0], w_ref[0], preferred_element_type=jnp.float32)
    y_ref[0] = y
    s = jnp.sum(y, axis=0, keepdims=True)            # (1, Ncol)
    q = jnp.sum(y * y, axis=0, keepdims=True)        # (1, Ncol)
    pad = jnp.zeros((6, y.shape[1]), jnp.float32)
    stats_ref[0, 0] = jnp.concatenate([s, q, pad], axis=0)   # (8, Ncol)


def _mm_tanh_kernel(p_ref, w_ref, o_ref):
    y = jnp.dot(p_ref[0], w_ref[0], preferred_element_type=jnp.float32)
    o_ref[0] = jnp.tanh(y)


def _affine_relu_kernel(y_ref, scale_ref, shift_ref, o_ref):
    out = y_ref[0] * scale_ref[0] + shift_ref[0]     # f32 BN affine
    o_ref[0] = jnp.maximum(out, 0.0).astype(o_ref.dtype)


# ---------------------------------------------------------------------------
# pallas_call wrappers
# ---------------------------------------------------------------------------
def _compiler_params():
    return pltpu.CompilerParams(
        dimension_semantics=("parallel", "parallel"),
        vmem_limit_bytes=VMEM_LIMIT)


def _mm_stats(P, W, tm):
    G, m_pad, K = P.shape
    ncol = W.shape[2]
    nt = m_pad // tm
    return pl.pallas_call(
        _mm_stats_kernel,
        out_shape=(jax.ShapeDtypeStruct((G, m_pad, ncol), jnp.float32),
                   jax.ShapeDtypeStruct((G, nt, 8, ncol), jnp.float32)),
        grid=(G, nt),
        in_specs=[pl.BlockSpec((1, tm, K), lambda g, m: (g, m, 0)),
                  pl.BlockSpec((1, K, ncol), lambda g, m: (g, 0, 0))],
        out_specs=(pl.BlockSpec((1, tm, ncol), lambda g, m: (g, m, 0)),
                   pl.BlockSpec((1, 1, 8, ncol), lambda g, m: (g, m, 0, 0))),
        compiler_params=_compiler_params(),
    )(P, W)


def _mm_tanh(P, W, tm):
    G, m_pad, K = P.shape
    ncol = W.shape[2]
    nt = m_pad // tm
    return pl.pallas_call(
        _mm_tanh_kernel,
        out_shape=jax.ShapeDtypeStruct((G, m_pad, ncol), jnp.float32),
        grid=(G, nt),
        in_specs=[pl.BlockSpec((1, tm, K), lambda g, m: (g, m, 0)),
                  pl.BlockSpec((1, K, ncol), lambda g, m: (g, 0, 0))],
        out_specs=pl.BlockSpec((1, tm, ncol), lambda g, m: (g, m, 0)),
        compiler_params=_compiler_params(),
    )(P, W)


def _affine_relu(y, scale, shift, tm, out_dtype):
    G, m_pad, ncol = y.shape
    nt = m_pad // tm
    return pl.pallas_call(
        _affine_relu_kernel,
        out_shape=jax.ShapeDtypeStruct((G, m_pad, ncol), out_dtype),
        grid=(G, nt),
        in_specs=[pl.BlockSpec((1, tm, ncol), lambda g, m: (g, m, 0)),
                  pl.BlockSpec((1, 1, ncol), lambda g, m: (0, 0, 0)),
                  pl.BlockSpec((1, 1, ncol), lambda g, m: (0, 0, 0))],
        out_specs=pl.BlockSpec((1, tm, ncol), lambda g, m: (g, m, 0)),
        compiler_params=_compiler_params(),
    )(y, scale, shift)


# ---------------------------------------------------------------------------
# Plain-JAX glue: BN stats reduction, phase decomposition, pixel shuffle
# ---------------------------------------------------------------------------
def _bn_scale_shift(sum_c, sumsq_c, count, gamma, beta):
    mean = sum_c / count
    var = sumsq_c / count - mean * mean
    scale = gamma * jax.lax.rsqrt(var + EPS)
    shift = beta - mean * scale
    return scale, shift


# For ConvTranspose2d(k=4, stride=2, pad=1): output row oh = 2*oy + ph only
# uses kernel taps kh with kh % 2 != ph % 2.  Entries are (tap kh, row offset
# into the 1-padded input), i.e. padded row index = oy + offset.
_PHASE_TAPS = {0: ((1, 1), (3, 0)),
               1: ((0, 2), (2, 1))}


def _stride2_phase_operands(h, wt, co_pad):
    """h: (N,H,W,CI) NHWC; wt: (CI,CO,4,4). -> P (4, N*H*W, CI*4), W (4, CI*4, co_pad)."""
    N, H, W, CI = h.shape
    CO = wt.shape[1]
    hp = jnp.pad(h, ((0, 0), (1, 1), (1, 1), (0, 0)))
    p_list, w_list = [], []
    for ph in range(2):
        for pw in range(2):
            slices, taps = [], []
            for kh, ro in _PHASE_TAPS[ph]:
                for kw, co_off in _PHASE_TAPS[pw]:
                    slices.append(hp[:, ro:ro + H, co_off:co_off + W, :])  # (N,H,W,CI)
                    taps.append(wt[:, :, kh, kw])                          # (CI,CO)
            pat = jnp.stack(slices, axis=-1)                  # (N,H,W,CI,4)
            p_list.append(pat.reshape(N * H * W, CI * 4))
            wm = jnp.stack(taps, axis=1).reshape(CI * 4, CO)  # rows ordered (ci, tap)
            w_list.append(_pad_axis(wm, co_pad, 1))
    return jnp.stack(p_list), jnp.stack(w_list)


def _phase_output_to_nhwc(y, N, H, W, CO):
    """y: (4, m_pad, co_pad), phase order (ph, pw) -> (N, 2H, 2W, CO)."""
    y = y[:, :N * H * W, :CO].reshape(2, 2, N, H, W, CO)
    y = jnp.transpose(y, (2, 3, 0, 4, 1, 5))                  # (N, H, ph, W, pw, CO)
    return y.reshape(N, 2 * H, 2 * W, CO)


# ---------------------------------------------------------------------------
# Layer implementations
# ---------------------------------------------------------------------------
def _first_block(x, wt, gamma, beta):
    """ConvT(nz->CO, 4, 1, 0) on (N, nz, 1, 1) + BN + ReLU, as a dense matmul."""
    N, nz = x.shape[0], x.shape[1]
    CO = wt.shape[1]
    ncol = 16 * CO                                   # = ngf*128 -> already lane-dense
    xf = x.reshape(N, nz)
    wm = jnp.transpose(wt, (0, 2, 3, 1)).reshape(nz, ncol)    # columns: (kh, kw, co)

    tm = _choose_tm(N)
    m_pad = _round_up(N, tm)
    P = _pad_axis(xf, m_pad, 0)[None].astype(jnp.bfloat16)    # (1, m_pad, nz)
    W = wm[None].astype(jnp.bfloat16)                         # (1, nz, 16*CO)
    y, stats = _mm_stats(P, W, tm)                            # y f32

    # Batch stats per channel over (N, 4, 4): fold the 16 spatial columns.
    sum_c = jnp.sum(stats[:, :, 0, :], axis=(0, 1)).reshape(16, CO).sum(0)
    ssq_c = jnp.sum(stats[:, :, 1, :], axis=(0, 1)).reshape(16, CO).sum(0)
    scale_c, shift_c = _bn_scale_shift(sum_c, ssq_c, float(N * 16), gamma, beta)
    scale = jnp.tile(scale_c, 16).reshape(1, 1, ncol)
    shift = jnp.tile(shift_c, 16).reshape(1, 1, ncol)

    a = _affine_relu(y, scale, shift, tm, jnp.bfloat16)       # (1, m_pad, 16*CO)
    return a[0, :N].reshape(N, 4, 4, CO)                      # NHWC bf16


def _stride2_bn_relu_block(h, wt, gamma, beta):
    """ConvT(CI->CO, 4, 2, 1) + BN + ReLU via 4-phase decomposition."""
    N, H, W, CI = h.shape
    CO = wt.shape[1]
    co_pad = _round_up(CO, LANE)
    P, Wm = _stride2_phase_operands(h, wt, co_pad)
    m_true = N * H * W
    tm = _choose_tm(m_true)
    m_pad = _round_up(m_true, tm)
    P = _pad_axis(P, m_pad, 1).astype(jnp.bfloat16)
    Wm = Wm.astype(jnp.bfloat16)

    y, stats = _mm_stats(P, Wm, tm)                           # (4, m_pad, co_pad)
    sum_c = jnp.sum(stats[:, :, 0, :], axis=(0, 1))
    ssq_c = jnp.sum(stats[:, :, 1, :], axis=(0, 1))
    gamma_p = _pad_axis(gamma, co_pad, 0)                     # padded channels: scale 0
    beta_p = _pad_axis(beta, co_pad, 0)
    scale, shift = _bn_scale_shift(sum_c, ssq_c, float(4 * m_true), gamma_p, beta_p)

    a = _affine_relu(y, scale.reshape(1, 1, co_pad), shift.reshape(1, 1, co_pad),
                     tm, jnp.bfloat16)
    return _phase_output_to_nhwc(a, N, H, W, CO)              # (N, 2H, 2W, CO) bf16


def _final_tanh_block(h, wt):
    """ConvT(CI->nc, 4, 2, 1) + Tanh via 4-phase decomposition, tanh fused."""
    N, H, W, CI = h.shape
    CO = wt.shape[1]
    co_pad = _round_up(CO, LANE)
    P, Wm = _stride2_phase_operands(h, wt, co_pad)
    m_true = N * H * W
    tm = _choose_tm(m_true)
    m_pad = _round_up(m_true, tm)
    P = _pad_axis(P, m_pad, 1).astype(jnp.bfloat16)
    Wm = Wm.astype(jnp.bfloat16)
    y = _mm_tanh(P, Wm, tm)                                   # (4, m_pad, co_pad) f32
    return _phase_output_to_nhwc(y, N, H, W, CO)              # (N, 2H, 2W, CO) f32


def generator_forward(x, params):
    """x: (N, nz, 1, 1) NCHW f32 -> (N, nc, 32, 32) NCHW f32."""
    wt1, g1, b1 = params["block1"]
    h = _first_block(x, wt1, g1, b1)                          # (N, 4, 4, ngf*8) NHWC
    for wt, g, b in params["blocks23"]:
        h = _stride2_bn_relu_block(h, wt, g, b)
    out_nhwc = _final_tanh_block(h, params["final"])
    return jnp.transpose(out_nhwc, (0, 3, 1, 2))              # NCHW at module boundary


# ---------------------------------------------------------------------------
# Pure-JAX reference (f32) for correctness check
# ---------------------------------------------------------------------------
def _ref_conv_transpose(x, wt, stride, pad):
    k = wt.shape[-1]
    w_conv = jnp.transpose(wt[:, :, ::-1, ::-1], (1, 0, 2, 3))  # (CO, CI, k, k)
    return jax.lax.conv_general_dilated(
        x, w_conv, window_strides=(1, 1),
        padding=[(k - 1 - pad, k - 1 - pad)] * 2,
        lhs_dilation=(stride, stride),
        dimension_numbers=("NCHW", "OIHW", "NCHW"))


def _ref_bn_relu(x, gamma, beta):
    mean = jnp.mean(x, axis=(0, 2, 3), keepdims=True)
    var = jnp.mean((x - mean) ** 2, axis=(0, 2, 3), keepdims=True)
    y = gamma[None, :, None, None] * (x - mean) * jax.lax.rsqrt(var + EPS) \
        + beta[None, :, None, None]
    return jnp.maximum(y, 0.0)


def ref_forward(x, params):
    wt1, g1, b1 = params["block1"]
    h = _ref_bn_relu(_ref_conv_transpose(x, wt1, 1, 0), g1, b1)
    for wt, g, b in params["blocks23"]:
        h = _ref_bn_relu(_ref_conv_transpose(h, wt, 2, 1), g, b)
    return jnp.tanh(_ref_conv_transpose(h, params["final"], 2, 1))


# ---------------------------------------------------------------------------
# Deterministic parameter init (DCGAN-style: N(0, 0.02) conv, N(1, 0.02) BN)
# ---------------------------------------------------------------------------
def init_params(key, nz, ngf, nc):
    ks = jax.random.split(key, 10)

    def conv_w(k, ci, co):
        return 0.02 * jax.random.normal(k, (ci, co, 4, 4), jnp.float32)

    def bn(kg, kb, c):
        gamma = 1.0 + 0.02 * jax.random.normal(kg, (c,), jnp.float32)
        beta = 0.02 * jax.random.normal(kb, (c,), jnp.float32)
        return gamma, beta

    g1, b1 = bn(ks[1], ks[2], ngf * 8)
    g2, b2 = bn(ks[4], ks[5], ngf * 4)
    g3, b3 = bn(ks[7], ks[8], ngf * 2)
    return {
        "block1": (conv_w(ks[0], nz, ngf * 8), g1, b1),
        "blocks23": (
            (conv_w(ks[3], ngf * 8, ngf * 4), g2, b2),
            (conv_w(ks[6], ngf * 4, ngf * 2), g3, b3),
        ),
        "final": conv_w(ks[9], ngf * 2, nc),
    }


# ---------------------------------------------------------------------------
if __name__ == "__main__":
    nz, ngf, nc, batch = 8, 4, 3, 2
    key = jax.random.PRNGKey(0)
    k_x, k_p = jax.random.split(key)
    x = jax.random.normal(k_x, (batch, nz, 1, 1), jnp.float32)  # NCHW latent
    params = init_params(k_p, nz, ngf, nc)

    fwd = jax.jit(generator_forward)
    out = jax.block_until_ready(fwd(x, params))
    assert out.shape == (batch, nc, 32, 32), out.shape

    ref = jax.block_until_ready(ref_forward(x, params))
    # bf16 matmul inputs (f32 accumulation) -> compare with a bf16-level tolerance.
    np.testing.assert_allclose(np.asarray(out), np.asarray(ref),
                               rtol=2e-2, atol=2e-2)
    print("KERNEL_OK")
</pallas_src>

<mosaic_0001>
module attributes {stable_mosaic.version = 11 : i64} {
  func.func @_mm_stats_kernel(%arg0: i32, %arg1: i32, %arg2: memref<1x8x8xbf16, #tpu.memory_space<vmem>>, %arg3: memref<1x8x512xbf16, #tpu.memory_space<vmem>>, %arg4: memref<1x8x512xf32, #tpu.memory_space<vmem>>, %arg5: memref<1x1x8x512xf32, #tpu.memory_space<vmem>>) attributes {dimension_semantics = [#tpu.dimension_semantics<parallel>, #tpu.dimension_semantics<parallel>], iteration_bounds = array<i64: 1, 1>, scalar_prefetch = 0 : i64, scratch_operands = 0 : i64, tpu.core_type = #tpu.core_type<tc>, window_params = [{transform_indices = @transform_0, window_bounds = array<i64: 1, 8, 8>}, {transform_indices = @transform_1, window_bounds = array<i64: 1, 8, 512>}, {transform_indices = @transform_2, window_bounds = array<i64: 1, 8, 512>}, {transform_indices = @transform_3, window_bounds = array<i64: 1, 1, 8, 512>}]} {
    %c0 = arith.constant 0 : index
    %c0_0 = arith.constant 0 : index
    %c0_1 = arith.constant 0 : index
    %0 = vector.load %arg2[%c0, %c0_0, %c0_1] : memref<1x8x8xbf16, #tpu.memory_space<vmem>>, vector<1x8x8xbf16>
    %1 = vector.shape_cast %0 : vector<1x8x8xbf16> to vector<8x8xbf16>
    %c0_2 = arith.constant 0 : index
    %c0_3 = arith.constant 0 : index
    %c0_4 = arith.constant 0 : index
    %2 = vector.load %arg3[%c0_2, %c0_3, %c0_4] : memref<1x8x512xbf16, #tpu.memory_space<vmem>>, vector<1x8x512xbf16>
    %3 = vector.shape_cast %2 : vector<1x8x512xbf16> to vector<8x512xbf16>
    %cst = arith.constant dense<0.000000e+00> : vector<8x512xf32>
    %4 = tpu.matmul %1, %3, %cst {dimension_numbers = #tpu.dot_dimension_numbers<[1], [0], [0], [1], [0, 0, 1, 1], [], []>} : vector<8x8xbf16>, vector<8x512xbf16>, vector<8x512xf32> -> vector<8x512xf32>
    %c0_5 = arith.constant 0 : index
    %c0_6 = arith.constant 0 : index
    %c0_7 = arith.constant 0 : index
    %5 = vector.load %arg4[%c0_5, %c0_6, %c0_7] : memref<1x8x512xf32, #tpu.memory_space<vmem>>, vector<1x8x512xf32>
    %6 = vector.shape_cast %5 : vector<1x8x512xf32> to vector<8x512xf32>
    %7 = vector.shape_cast %4 : vector<8x512xf32> to vector<1x8x512xf32>
    tpu.vector_store %arg4[%c0_5, %c0_6, %c0_7], %7 {strides = array<i32>} : memref<1x8x512xf32, #tpu.memory_space<vmem>>, vector<1x8x512xf32>,
    %cst_8 = arith.constant dense<0.000000e+00> : vector<512xf32>
    %8 = vector.multi_reduction <add>, %4, %cst_8 [0] : vector<8x512xf32> to vector<512xf32>
    %9 = vector.shape_cast %8 : vector<512xf32> to vector<1x512xf32>
    %10 = arith.mulf %4, %4 : vector<8x512xf32>
    %cst_9 = arith.constant dense<0.000000e+00> : vector<512xf32>
    %11 = vector.multi_reduction <add>, %10, %cst_9 [0] : vector<8x512xf32> to vector<512xf32>
    %12 = vector.shape_cast %11 : vector<512xf32> to vector<1x512xf32>
    %cst_10 = arith.constant 0.000000e+00 : f32
    %13 = vector.broadcast %cst_10 : f32 to vector<6x512xf32>
    %14 = tpu.concatenate %9, %12, %13 in 0 : vector<1x512xf32>, vector<1x512xf32>, vector<6x512xf32> -> vector<8x512xf32>
    %c0_11 = arith.constant 0 : index
    %c0_12 = arith.constant 0 : index
    %c0_13 = arith.constant 0 : index
    %c0_14 = arith.constant 0 : index
    %15 = vector.load %arg5[%c0_11, %c0_12, %c0_13, %c0_14] : memref<1x1x8x512xf32, #tpu.memory_space<vmem>>, vector<1x1x8x512xf32>
    %16 = vector.shape_cast %15 : vector<1x1x8x512xf32> to vector<8x512xf32>
    %17 = vector.shape_cast %14 : vector<8x512xf32> to vector<1x1x8x512xf32>
    tpu.vector_store %arg5[%c0_11, %c0_12, %c0_13, %c0_14], %17 {strides = array<i32>} : memref<1x1x8x512xf32, #tpu.memory_space<vmem>>, vector<1x1x8x512xf32>,
    return
  }
  func.func @transform_0(%arg0: i32, %arg1: i32) -> (i32, i32, i32) {
    %c0_i32 = arith.constant 0 : i32
    %c0_i32_0 = arith.constant 0 : i32
    return %arg0, %arg1, %c0_i32 : i32, i32, i32
  }
  func.func @transform_1(%arg0: i32, %arg1: i32) -> (i32, i32, i32) {
    %c0_i32 = arith.constant 0 : i32
    %c0_i32_0 = arith.constant 0 : i32
    %c0_i32_1 = arith.constant 0 : i32
    return %arg0, %c0_i32, %c0_i32_0 : i32, i32, i32
  }
  func.func @transform_2(%arg0: i32, %arg1: i32) -> (i32, i32, i32) {
    %c0_i32 = arith.constant 0 : i32
    %c0_i32_0 = arith.constant 0 : i32
    return %arg0, %arg1, %c0_i32 : i32, i32, i32
  }
  func.func @transform_3(%arg0: i32, %arg1: i32) -> (i32, i32, i32, i32) {
    %c0_i32 = arith.constant 0 : i32
    %c0_i32_0 = arith.constant 0 : i32
    %c0_i32_1 = arith.constant 0 : i32
    return %arg0, %arg1, %c0_i32, %c0_i32_0 : i32, i32, i32, i32
  }
}

module attributes {stable_mosaic.version = 11 : i64} {
  func.func @_affine_relu_kernel(%arg0: i32, %arg1: i32, %arg2: memref<1x8x512xf32, #tpu.memory_space<vmem>>, %arg3: memref<1x1x512xf32, #tpu.memory_space<vmem>>, %arg4: memref<1x1x512xf32, #tpu.memory_space<vmem>>, %arg5: memref<1x8x512xbf16, #tpu.memory_space<vmem>>) attributes {dimension_semantics = [#tpu.dimension_semantics<parallel>, #tpu.dimension_semantics<parallel>], iteration_bounds = array<i64: 1, 1>, scalar_prefetch = 0 : i64, scratch_operands = 0 : i64, tpu.core_type = #tpu.core_type<tc>, window_params = [{transform_indices = @transform_0, window_bounds = array<i64: 1, 8, 512>}, {pipeline_mode = #tpu.pipeline_mode<synchronous>, transform_indices = @transform_1, window_bounds = array<i64: 1, 1, 512>}, {pipeline_mode = #tpu.pipeline_mode<synchronous>, transform_indices = @transform_2, window_bounds = array<i64: 1, 1, 512>}, {transform_indices = @transform_3, window_bounds = array<i64: 1, 8, 512>}]} {
    %c0 = arith.constant 0 : index
    %c0_0 = arith.constant 0 : index
    %c0_1 = arith.constant 0 : index
    %0 = vector.load %arg2[%c0, %c0_0, %c0_1] : memref<1x8x512xf32, #tpu.memory_space<vmem>>, vector<1x8x512xf32>
    %1 = vector.shape_cast %0 : vector<1x8x512xf32> to vector<8x512xf32>
    %c0_2 = arith.constant 0 : index
    %c0_3 = arith.constant 0 : index
    %c0_4 = arith.constant 0 : index
    %2 = vector.load %arg3[%c0_2, %c0_3, %c0_4] : memref<1x1x512xf32, #tpu.memory_space<vmem>>, vector<1x1x512xf32>
    %3 = vector.shape_cast %2 : vector<1x1x512xf32> to vector<1x512xf32>
    %4 = vector.broadcast %3 : vector<1x512xf32> to vector<8x512xf32>
    %5 = arith.mulf %1, %4 : vector<8x512xf32>
    %c0_5 = arith.constant 0 : index
    %c0_6 = arith.constant 0 : index
    %c0_7 = arith.constant 0 : index
    %6 = vector.load %arg4[%c0_5, %c0_6, %c0_7] : memref<1x1x512xf32, #tpu.memory_space<vmem>>, vector<1x1x512xf32>
    %7 = vector.shape_cast %6 : vector<1x1x512xf32> to vector<1x512xf32>
    %8 = vector.broadcast %7 : vector<1x512xf32> to vector<8x512xf32>
    %9 = arith.addf %5, %8 : vector<8x512xf32>
    %cst = arith.constant 0.000000e+00 : f32
    %10 = vector.broadcast %cst : f32 to vector<8x512xf32>
    %11 = arith.maximumf %9, %10 : vector<8x512xf32>
    %12 = arith.truncf %11 : vector<8x512xf32> to vector<8x512xbf16>
    %c0_8 = arith.constant 0 : index
    %c0_9 = arith.constant 0 : index
    %c0_10 = arith.constant 0 : index
    %13 = vector.load %arg5[%c0_8, %c0_9, %c0_10] : memref<1x8x512xbf16, #tpu.memory_space<vmem>>, vector<1x8x512xbf16>
    %14 = vector.shape_cast %13 : vector<1x8x512xbf16> to vector<8x512xbf16>
    %15 = vector.shape_cast %12 : vector<8x512xbf16> to vector<1x8x512xbf16>
    tpu.vector_store %arg5[%c0_8, %c0_9, %c0_10], %15 {strides = array<i32>} : memref<1x8x512xbf16, #tpu.memory_space<vmem>>, vector<1x8x512xbf16>,
    return
  }
  func.func @transform_0(%arg0: i32, %arg1: i32) -> (i32, i32, i32) {
    %c0_i32 = arith.constant 0 : i32
    %c0_i32_0 = arith.constant 0 : i32
    return %arg0, %arg1, %c0_i32 : i32, i32, i32
  }
  func.func @transform_1(%arg0: i32, %arg1: i32) -> (i32, i32, i32) {
    %c0_i32 = arith.constant 0 : i32
    %c0_i32_0 = arith.constant 0 : i32
    %c0_i32_1 = arith.constant 0 : i32
    %c0_i32_2 = arith.constant 0 : i32
    return %c0_i32, %c0_i32_0, %c0_i32_1 : i32, i32, i32
  }
  func.func @transform_2(%arg0: i32, %arg1: i32) -> (i32, i32, i32) {
    %c0_i32 = arith.constant 0 : i32
    %c0_i32_0 = arith.constant 0 : i32
    %c0_i32_1 = arith.constant 0 : i32
    %c0_i32_2 = arith.constant 0 : i32
    return %c0_i32, %c0_i32_0, %c0_i32_1 : i32, i32, i32
  }
  func.func @transform_3(%arg0: i32, %arg1: i32) -> (i32, i32, i32) {
    %c0_i32 = arith.constant 0 : i32
    %c0_i32_0 = arith.constant 0 : i32
    return %arg0, %arg1, %c0_i32 : i32, i32, i32
  }
}

module attributes {stable_mosaic.version = 11 : i64} {
  func.func @_mm_stats_kernel(%arg0: i32, %arg1: i32, %arg2: memref<1x32x128xbf16, #tpu.memory_space<vmem>>, %arg3: memref<1x128x128xbf16, #tpu.memory_space<vmem>>, %arg4: memref<1x32x128xf32, #tpu.memory_space<vmem>>, %arg5: memref<1x1x8x128xf32, #tpu.memory_space<vmem>>) attributes {dimension_semantics = [#tpu.dimension_semantics<parallel>, #tpu.dimension_semantics<parallel>], iteration_bounds = array<i64: 4, 1>, scalar_prefetch = 0 : i64, scratch_operands = 0 : i64, tpu.core_type = #tpu.core_type<tc>, window_params = [{transform_indices = @transform_0, window_bounds = array<i64: 1, 32, 128>}, {transform_indices = @transform_1, window_bounds = array<i64: 1, 128, 128>}, {transform_indices = @transform_2, window_bounds = array<i64: 1, 32, 128>}, {transform_indices = @transform_3, window_bounds = array<i64: 1, 1, 8, 128>}]} {
    %c0 = arith.constant 0 : index
    %c0_0 = arith.constant 0 : index
    %c0_1 = arith.constant 0 : index
    %0 = vector.load %arg2[%c0, %c0_0, %c0_1] : memref<1x32x128xbf16, #tpu.memory_space<vmem>>, vector<1x32x128xbf16>
    %1 = vector.shape_cast %0 : vector<1x32x128xbf16> to vector<32x128xbf16>
    %c0_2 = arith.constant 0 : index
    %c0_3 = arith.constant 0 : index
    %c0_4 = arith.constant 0 : index
    %2 = vector.load %arg3[%c0_2, %c0_3, %c0_4] : memref<1x128x128xbf16, #tpu.memory_space<vmem>>, vector<1x128x128xbf16>
    %3 = vector.shape_cast %2 : vector<1x128x128xbf16> to vector<128x128xbf16>
    %cst = arith.constant dense<0.000000e+00> : vector<32x128xf32>
    %4 = tpu.matmul %1, %3, %cst {dimension_numbers = #tpu.dot_dimension_numbers<[1], [0], [0], [1], [0, 0, 1, 1], [], []>} : vector<32x128xbf16>, vector<128x128xbf16>, vector<32x128xf32> -> vector<32x128xf32>
    %c0_5 = arith.constant 0 : index
    %c0_6 = arith.constant 0 : index
    %c0_7 = arith.constant 0 : index
    %5 = vector.load %arg4[%c0_5, %c0_6, %c0_7] : memref<1x32x128xf32, #tpu.memory_space<vmem>>, vector<1x32x128xf32>
    %6 = vector.shape_cast %5 : vector<1x32x128xf32> to vector<32x128xf32>
    %7 = vector.shape_cast %4 : vector<32x128xf32> to vector<1x32x128xf32>
    tpu.vector_store %arg4[%c0_5, %c0_6, %c0_7], %7 {strides = array<i32>} : memref<1x32x128xf32, #tpu.memory_space<vmem>>, vector<1x32x128xf32>,
    %cst_8 = arith.constant dense<0.000000e+00> : vector<128xf32>
    %8 = vector.multi_reduction <add>, %4, %cst_8 [0] : vector<32x128xf32> to vector<128xf32>
    %9 = vector.shape_cast %8 : vector<128xf32> to vector<1x128xf32>
    %10 = arith.mulf %4, %4 : vector<32x128xf32>
    %cst_9 = arith.constant dense<0.000000e+00> : vector<128xf32>
    %11 = vector.multi_reduction <add>, %10, %cst_9 [0] : vector<32x128xf32> to vector<128xf32>
    %12 = vector.shape_cast %11 : vector<128xf32> to vector<1x128xf32>
    %cst_10 = arith.constant 0.000000e+00 : f32
    %13 = vector.broadcast %cst_10 : f32 to vector<6x128xf32>
    %14 = tpu.concatenate %9, %12, %13 in 0 : vector<1x128xf32>, vector<1x128xf32>, vector<6x128xf32> -> vector<8x128xf32>
    %c0_11 = arith.constant 0 : index
    %c0_12 = arith.constant 0 : index
    %c0_13 = arith.constant 0 : index
    %c0_14 = arith.constant 0 : index
    %15 = vector.load %arg5[%c0_11, %c0_12, %c0_13, %c0_14] : memref<1x1x8x128xf32, #tpu.memory_space<vmem>>, vector<1x1x8x128xf32>
    %16 = vector.shape_cast %15 : vector<1x1x8x128xf32> to vector<8x128xf32>
    %17 = vector.shape_cast %14 : vector<8x128xf32> to vector<1x1x8x128xf32>
    tpu.vector_store %arg5[%c0_11, %c0_12, %c0_13, %c0_14], %17 {strides = array<i32>} : memref<1x1x8x128xf32, #tpu.memory_space<vmem>>, vector<1x1x8x128xf32>,
    return
  }
  func.func @transform_0(%arg0: i32, %arg1: i32) -> (i32, i32, i32) {
    %c0_i32 = arith.constant 0 : i32
    %c0_i32_0 = arith.constant 0 : i32
    return %arg0, %arg1, %c0_i32 : i32, i32, i32
  }
  func.func @transform_1(%arg0: i32, %arg1: i32) -> (i32, i32, i32) {
    %c0_i32 = arith.constant 0 : i32
    %c0_i32_0 = arith.constant 0 : i32
    %c0_i32_1 = arith.constant 0 : i32
    return %arg0, %c0_i32, %c0_i32_0 : i32, i32, i32
  }
  func.func @transform_2(%arg0: i32, %arg1: i32) -> (i32, i32, i32) {
    %c0_i32 = arith.constant 0 : i32
    %c0_i32_0 = arith.constant 0 : i32
    return %arg0, %arg1, %c0_i32 : i32, i32, i32
  }
  func.func @transform_3(%arg0: i32, %arg1: i32) -> (i32, i32, i32, i32) {
    %c0_i32 = arith.constant 0 : i32
    %c0_i32_0 = arith.constant 0 : i32
    %c0_i32_1 = arith.constant 0 : i32
    return %arg0, %arg1, %c0_i32, %c0_i32_0 : i32, i32, i32, i32
  }
}

module attributes {stable_mosaic.version = 11 : i64} {
  func.func @_affine_relu_kernel(%arg0: i32, %arg1: i32, %arg2: memref<1x32x128xf32, #tpu.memory_space<vmem>>, %arg3: memref<1x1x128xf32, #tpu.memory_space<vmem>>, %arg4: memref<1x1x128xf32, #tpu.memory_space<vmem>>, %arg5: memref<1x32x128xbf16, #tpu.memory_space<vmem>>) attributes {dimension_semantics = [#tpu.dimension_semantics<parallel>, #tpu.dimension_semantics<parallel>], iteration_bounds = array<i64: 4, 1>, scalar_prefetch = 0 : i64, scratch_operands = 0 : i64, tpu.core_type = #tpu.core_type<tc>, window_params = [{transform_indices = @transform_0, window_bounds = array<i64: 1, 32, 128>}, {pipeline_mode = #tpu.pipeline_mode<synchronous>, transform_indices = @transform_1, window_bounds = array<i64: 1, 1, 128>}, {pipeline_mode = #tpu.pipeline_mode<synchronous>, transform_indices = @transform_2, window_bounds = array<i64: 1, 1, 128>}, {transform_indices = @transform_3, window_bounds = array<i64: 1, 32, 128>}]} {
    %c0 = arith.constant 0 : index
    %c0_0 = arith.constant 0 : index
    %c0_1 = arith.constant 0 : index
    %0 = vector.load %arg2[%c0, %c0_0, %c0_1] : memref<1x32x128xf32, #tpu.memory_space<vmem>>, vector<1x32x128xf32>
    %1 = vector.shape_cast %0 : vector<1x32x128xf32> to vector<32x128xf32>
    %c0_2 = arith.constant 0 : index
    %c0_3 = arith.constant 0 : index
    %c0_4 = arith.constant 0 : index
    %2 = vector.load %arg3[%c0_2, %c0_3, %c0_4] : memref<1x1x128xf32, #tpu.memory_space<vmem>>, vector<1x1x128xf32>
    %3 = vector.shape_cast %2 : vector<1x1x128xf32> to vector<1x128xf32>
    %4 = vector.broadcast %3 : vector<1x128xf32> to vector<32x128xf32>
    %5 = arith.mulf %1, %4 : vector<32x128xf32>
    %c0_5 = arith.constant 0 : index
    %c0_6 = arith.constant 0 : index
    %c0_7 = arith.constant 0 : index
    %6 = vector.load %arg4[%c0_5, %c0_6, %c0_7] : memref<1x1x128xf32, #tpu.memory_space<vmem>>, vector<1x1x128xf32>
    %7 = vector.shape_cast %6 : vector<1x1x128xf32> to vector<1x128xf32>
    %8 = vector.broadcast %7 : vector<1x128xf32> to vector<32x128xf32>
    %9 = arith.addf %5, %8 : vector<32x128xf32>
    %cst = arith.constant 0.000000e+00 : f32
    %10 = vector.broadcast %cst : f32 to vector<32x128xf32>
    %11 = arith.maximumf %9, %10 : vector<32x128xf32>
    %12 = arith.truncf %11 : vector<32x128xf32> to vector<32x128xbf16>
    %c0_8 = arith.constant 0 : index
    %c0_9 = arith.constant 0 : index
    %c0_10 = arith.constant 0 : index
    %13 = vector.load %arg5[%c0_8, %c0_9, %c0_10] : memref<1x32x128xbf16, #tpu.memory_space<vmem>>, vector<1x32x128xbf16>
    %14 = vector.shape_cast %13 : vector<1x32x128xbf16> to vector<32x128xbf16>
    %15 = vector.shape_cast %12 : vector<32x128xbf16> to vector<1x32x128xbf16>
    tpu.vector_store %arg5[%c0_8, %c0_9, %c0_10], %15 {strides = array<i32>} : memref<1x32x128xbf16, #tpu.memory_space<vmem>>, vector<1x32x128xbf16>,
    return
  }
  func.func @transform_0(%arg0: i32, %arg1: i32) -> (i32, i32, i32) {
    %c0_i32 = arith.constant 0 : i32
    %c0_i32_0 = arith.constant 0 : i32
    return %arg0, %arg1, %c0_i32 : i32, i32, i32
  }
  func.func @transform_1(%arg0: i32, %arg1: i32) -> (i32, i32, i32) {
    %c0_i32 = arith.constant 0 : i32
    %c0_i32_0 = arith.constant 0 : i32
    %c0_i32_1 = arith.constant 0 : i32
    %c0_i32_2 = arith.constant 0 : i32
    return %c0_i32, %c0_i32_0, %c0_i32_1 : i32, i32, i32
  }
  func.func @transform_2(%arg0: i32, %arg1: i32) -> (i32, i32, i32) {
    %c0_i32 = arith.constant 0 : i32
    %c0_i32_0 = arith.constant 0 : i32
    %c0_i32_1 = arith.constant 0 : i32
    %c0_i32_2 = arith.constant 0 : i32
    return %c0_i32, %c0_i32_0, %c0_i32_1 : i32, i32, i32
  }
  func.func @transform_3(%arg0: i32, %arg1: i32) -> (i32, i32, i32) {
    %c0_i32 = arith.constant 0 : i32
    %c0_i32_0 = arith.constant 0 : i32
    return %arg0, %arg1, %c0_i32 : i32, i32, i32
  }
}

module attributes {stable_mosaic.version = 11 : i64} {
  func.func @_mm_stats_kernel(%arg0: i32, %arg1: i32, %arg2: memref<1x128x64xbf16, #tpu.memory_space<vmem>>, %arg3: memref<1x64x128xbf16, #tpu.memory_space<vmem>>, %arg4: memref<1x128x128xf32, #tpu.memory_space<vmem>>, %arg5: memref<1x1x8x128xf32, #tpu.memory_space<vmem>>) attributes {dimension_semantics = [#tpu.dimension_semantics<parallel>, #tpu.dimension_semantics<parallel>], iteration_bounds = array<i64: 4, 1>, scalar_prefetch = 0 : i64, scratch_operands = 0 : i64, tpu.core_type = #tpu.core_type<tc>, window_params = [{transform_indices = @transform_0, window_bounds = array<i64: 1, 128, 64>}, {transform_indices = @transform_1, window_bounds = array<i64: 1, 64, 128>}, {transform_indices = @transform_2, window_bounds = array<i64: 1, 128, 128>}, {transform_indices = @transform_3, window_bounds = array<i64: 1, 1, 8, 128>}]} {
    %c0 = arith.constant 0 : index
    %c0_0 = arith.constant 0 : index
    %c0_1 = arith.constant 0 : index
    %0 = vector.load %arg2[%c0, %c0_0, %c0_1] : memref<1x128x64xbf16, #tpu.memory_space<vmem>>, vector<1x128x64xbf16>
    %1 = vector.shape_cast %0 : vector<1x128x64xbf16> to vector<128x64xbf16>
    %c0_2 = arith.constant 0 : index
    %c0_3 = arith.constant 0 : index
    %c0_4 = arith.constant 0 : index
    %2 = vector.load %arg3[%c0_2, %c0_3, %c0_4] : memref<1x64x128xbf16, #tpu.memory_space<vmem>>, vector<1x64x128xbf16>
    %3 = vector.shape_cast %2 : vector<1x64x128xbf16> to vector<64x128xbf16>
    %cst = arith.constant dense<0.000000e+00> : vector<128x128xf32>
    %4 = tpu.matmul %1, %3, %cst {dimension_numbers = #tpu.dot_dimension_numbers<[1], [0], [0], [1], [0, 0, 1, 1], [], []>} : vector<128x64xbf16>, vector<64x128xbf16>, vector<128x128xf32> -> vector<128x128xf32>
    %c0_5 = arith.constant 0 : index
    %c0_6 = arith.constant 0 : index
    %c0_7 = arith.constant 0 : index
    %5 = vector.load %arg4[%c0_5, %c0_6, %c0_7] : memref<1x128x128xf32, #tpu.memory_space<vmem>>, vector<1x128x128xf32>
    %6 = vector.shape_cast %5 : vector<1x128x128xf32> to vector<128x128xf32>
    %7 = vector.shape_cast %4 : vector<128x128xf32> to vector<1x128x128xf32>
    tpu.vector_store %arg4[%c0_5, %c0_6, %c0_7], %7 {strides = array<i32>} : memref<1x128x128xf32, #tpu.memory_space<vmem>>, vector<1x128x128xf32>,
    %cst_8 = arith.constant dense<0.000000e+00> : vector<128xf32>
    %8 = vector.multi_reduction <add>, %4, %cst_8 [0] : vector<128x128xf32> to vector<128xf32>
    %9 = vector.shape_cast %8 : vector<128xf32> to vector<1x128xf32>
    %10 = arith.mulf %4, %4 : vector<128x128xf32>
    %cst_9 = arith.constant dense<0.000000e+00> : vector<128xf32>
    %11 = vector.multi_reduction <add>, %10, %cst_9 [0] : vector<128x128xf32> to vector<128xf32>
    %12 = vector.shape_cast %11 : vector<128xf32> to vector<1x128xf32>
    %cst_10 = arith.constant 0.000000e+00 : f32
    %13 = vector.broadcast %cst_10 : f32 to vector<6x128xf32>
    %14 = tpu.concatenate %9, %12, %13 in 0 : vector<1x128xf32>, vector<1x128xf32>, vector<6x128xf32> -> vector<8x128xf32>
    %c0_11 = arith.constant 0 : index
    %c0_12 = arith.constant 0 : index
    %c0_13 = arith.constant 0 : index
    %c0_14 = arith.constant 0 : index
    %15 = vector.load %arg5[%c0_11, %c0_12, %c0_13, %c0_14] : memref<1x1x8x128xf32, #tpu.memory_space<vmem>>, vector<1x1x8x128xf32>
    %16 = vector.shape_cast %15 : vector<1x1x8x128xf32> to vector<8x128xf32>
    %17 = vector.shape_cast %14 : vector<8x128xf32> to vector<1x1x8x128xf32>
    tpu.vector_store %arg5[%c0_11, %c0_12, %c0_13, %c0_14], %17 {strides = array<i32>} : memref<1x1x8x128xf32, #tpu.memory_space<vmem>>, vector<1x1x8x128xf32>,
    return
  }
  func.func @transform_0(%arg0: i32, %arg1: i32) -> (i32, i32, i32) {
    %c0_i32 = arith.constant 0 : i32
    %c0_i32_0 = arith.constant 0 : i32
    return %arg0, %arg1, %c0_i32 : i32, i32, i32
  }
  func.func @transform_1(%arg0: i32, %arg1: i32) -> (i32, i32, i32) {
    %c0_i32 = arith.constant 0 : i32
    %c0_i32_0 = arith.constant 0 : i32
    %c0_i32_1 = arith.constant 0 : i32
    return %arg0, %c0_i32, %c0_i32_0 : i32, i32, i32
  }
  func.func @transform_2(%arg0: i32, %arg1: i32) -> (i32, i32, i32) {
    %c0_i32 = arith.constant 0 : i32
    %c0_i32_0 = arith.constant 0 : i32
    return %arg0, %arg1, %c0_i32 : i32, i32, i32
  }
  func.func @transform_3(%arg0: i32, %arg1: i32) -> (i32, i32, i32, i32) {
    %c0_i32 = arith.constant 0 : i32
    %c0_i32_0 = arith.constant 0 : i32
    %c0_i32_1 = arith.constant 0 : i32
    return %arg0, %arg1, %c0_i32, %c0_i32_0 : i32, i32, i32, i32
  }
}

module attributes {stable_mosaic.version = 11 : i64} {
  func.func @_affine_relu_kernel(%arg0: i32, %arg1: i32, %arg2: memref<1x128x128xf32, #tpu.memory_space<vmem>>, %arg3: memref<1x1x128xf32, #tpu.memory_space<vmem>>, %arg4: memref<1x1x128xf32, #tpu.memory_space<vmem>>, %arg5: memref<1x128x128xbf16, #tpu.memory_space<vmem>>) attributes {dimension_semantics = [#tpu.dimension_semantics<parallel>, #tpu.dimension_semantics<parallel>], iteration_bounds = array<i64: 4, 1>, scalar_prefetch = 0 : i64, scratch_operands = 0 : i64, tpu.core_type = #tpu.core_type<tc>, window_params = [{transform_indices = @transform_0, window_bounds = array<i64: 1, 128, 128>}, {pipeline_mode = #tpu.pipeline_mode<synchronous>, transform_indices = @transform_1, window_bounds = array<i64: 1, 1, 128>}, {pipeline_mode = #tpu.pipeline_mode<synchronous>, transform_indices = @transform_2, window_bounds = array<i64: 1, 1, 128>}, {transform_indices = @transform_3, window_bounds = array<i64: 1, 128, 128>}]} {
    %c0 = arith.constant 0 : index
    %c0_0 = arith.constant 0 : index
    %c0_1 = arith.constant 0 : index
    %0 = vector.load %arg2[%c0, %c0_0, %c0_1] : memref<1x128x128xf32, #tpu.memory_space<vmem>>, vector<1x128x128xf32>
    %1 = vector.shape_cast %0 : vector<1x128x128xf32> to vector<128x128xf32>
    %c0_2 = arith.constant 0 : index
    %c0_3 = arith.constant 0 : index
    %c0_4 = arith.constant 0 : index
    %2 = vector.load %arg3[%c0_2, %c0_3, %c0_4] : memref<1x1x128xf32, #tpu.memory_space<vmem>>, vector<1x1x128xf32>
    %3 = vector.shape_cast %2 : vector<1x1x128xf32> to vector<1x128xf32>
    %4 = vector.broadcast %3 : vector<1x128xf32> to vector<128x128xf32>
    %5 = arith.mulf %1, %4 : vector<128x128xf32>
    %c0_5 = arith.constant 0 : index
    %c0_6 = arith.constant 0 : index
    %c0_7 = arith.constant 0 : index
    %6 = vector.load %arg4[%c0_5, %c0_6, %c0_7] : memref<1x1x128xf32, #tpu.memory_space<vmem>>, vector<1x1x128xf32>
    %7 = vector.shape_cast %6 : vector<1x1x128xf32> to vector<1x128xf32>
    %8 = vector.broadcast %7 : vector<1x128xf32> to vector<128x128xf32>
    %9 = arith.addf %5, %8 : vector<128x128xf32>
    %cst = arith.constant 0.000000e+00 : f32
    %10 = vector.broadcast %cst : f32 to vector<128x128xf32>
    %11 = arith.maximumf %9, %10 : vector<128x128xf32>
    %12 = arith.truncf %11 : vector<128x128xf32> to vector<128x128xbf16>
    %c0_8 = arith.constant 0 : index
    %c0_9 = arith.constant 0 : index
    %c0_10 = arith.constant 0 : index
    %13 = vector.load %arg5[%c0_8, %c0_9, %c0_10] : memref<1x128x128xbf16, #tpu.memory_space<vmem>>, vector<1x128x128xbf16>
    %14 = vector.shape_cast %13 : vector<1x128x128xbf16> to vector<128x128xbf16>
    %15 = vector.shape_cast %12 : vector<128x128xbf16> to vector<1x128x128xbf16>
    tpu.vector_store %arg5[%c0_8, %c0_9, %c0_10], %15 {strides = array<i32>} : memref<1x128x128xbf16, #tpu.memory_space<vmem>>, vector<1x128x128xbf16>,
    return
  }
  func.func @transform_0(%arg0: i32, %arg1: i32) -> (i32, i32, i32) {
    %c0_i32 = arith.constant 0 : i32
    %c0_i32_0 = arith.constant 0 : i32
    return %arg0, %arg1, %c0_i32 : i32, i32, i32
  }
  func.func @transform_1(%arg0: i32, %arg1: i32) -> (i32, i32, i32) {
    %c0_i32 = arith.constant 0 : i32
    %c0_i32_0 = arith.constant 0 : i32
    %c0_i32_1 = arith.constant 0 : i32
    %c0_i32_2 = arith.constant 0 : i32
    return %c0_i32, %c0_i32_0, %c0_i32_1 : i32, i32, i32
  }
  func.func @transform_2(%arg0: i32, %arg1: i32) -> (i32, i32, i32) {
    %c0_i32 = arith.constant 0 : i32
    %c0_i32_0 = arith.constant 0 : i32
    %c0_i32_1 = arith.constant 0 : i32
    %c0_i32_2 = arith.constant 0 : i32
    return %c0_i32, %c0_i32_0, %c0_i32_1 : i32, i32, i32
  }
  func.func @transform_3(%arg0: i32, %arg1: i32) -> (i32, i32, i32) {
    %c0_i32 = arith.constant 0 : i32
    %c0_i32_0 = arith.constant 0 : i32
    return %arg0, %arg1, %c0_i32 : i32, i32, i32
  }
}

module attributes {stable_mosaic.version = 11 : i64} {
  func.func @_mm_tanh_kernel(%arg0: i32, %arg1: i32, %arg2: memref<1x512x32xbf16, #tpu.memory_space<vmem>>, %arg3: memref<1x32x128xbf16, #tpu.memory_space<vmem>>, %arg4: memref<1x512x128xf32, #tpu.memory_space<vmem>>) attributes {dimension_semantics = [#tpu.dimension_semantics<parallel>, #tpu.dimension_semantics<parallel>], iteration_bounds = array<i64: 4, 1>, scalar_prefetch = 0 : i64, scratch_operands = 0 : i64, tpu.core_type = #tpu.core_type<tc>, window_params = [{transform_indices = @transform_0, window_bounds = array<i64: 1, 512, 32>}, {transform_indices = @transform_1, window_bounds = array<i64: 1, 32, 128>}, {transform_indices = @transform_2, window_bounds = array<i64: 1, 512, 128>}]} {
    %c0 = arith.constant 0 : index
    %c0_0 = arith.constant 0 : index
    %c0_1 = arith.constant 0 : index
    %0 = vector.load %arg2[%c0, %c0_0, %c0_1] : memref<1x512x32xbf16, #tpu.memory_space<vmem>>, vector<1x512x32xbf16>
    %1 = vector.shape_cast %0 : vector<1x512x32xbf16> to vector<512x32xbf16>
    %c0_2 = arith.constant 0 : index
    %c0_3 = arith.constant 0 : index
    %c0_4 = arith.constant 0 : index
    %2 = vector.load %arg3[%c0_2, %c0_3, %c0_4] : memref<1x32x128xbf16, #tpu.memory_space<vmem>>, vector<1x32x128xbf16>
    %3 = vector.shape_cast %2 : vector<1x32x128xbf16> to vector<32x128xbf16>
    %cst = arith.constant dense<0.000000e+00> : vector<512x128xf32>
    %4 = tpu.matmul %1, %3, %cst {dimension_numbers = #tpu.dot_dimension_numbers<[1], [0], [0], [1], [0, 0, 1, 1], [], []>} : vector<512x32xbf16>, vector<32x128xbf16>, vector<512x128xf32> -> vector<512x128xf32>
    %5 = math.tanh %4 : vector<512x128xf32>
    %c0_5 = arith.constant 0 : index
    %c0_6 = arith.constant 0 : index
    %c0_7 = arith.constant 0 : index
    %6 = vector.load %arg4[%c0_5, %c0_6, %c0_7] : memref<1x512x128xf32, #tpu.memory_space<vmem>>, vector<1x512x128xf32>
    %7 = vector.shape_cast %6 : vector<1x512x128xf32> to vector<512x128xf32>
    %8 = vector.shape_cast %5 : vector<512x128xf32> to vector<1x512x128xf32>
    tpu.vector_store %arg4[%c0_5, %c0_6, %c0_7], %8 {strides = array<i32>} : memref<1x512x128xf32, #tpu.memory_space<vmem>>, vector<1x512x128xf32>,
    return
  }
  func.func @transform_0(%arg0: i32, %arg1: i32) -> (i32, i32, i32) {
    %c0_i32 = arith.constant 0 : i32
    %c0_i32_0 = arith.constant 0 : i32
    return %arg0, %arg1, %c0_i32 : i32, i32, i32
  }
  func.func @transform_1(%arg0: i32, %arg1: i32) -> (i32, i32, i32) {
    %c0_i32 = arith.constant 0 : i32
    %c0_i32_0 = arith.constant 0 : i32
    %c0_i32_1 = arith.constant 0 : i32
    return %arg0, %c0_i32, %c0_i32_0 : i32, i32, i32
  }
  func.func @transform_2(%arg0: i32, %arg1: i32) -> (i32, i32, i32) {
    %c0_i32 = arith.constant 0 : i32
    %c0_i32_0 = arith.constant 0 : i32
    return %arg0, %arg1, %c0_i32 : i32, i32, i32
  }
}

</mosaic_0001>

<bundles_post_ra>
// kernel: tile.13
= control target key start
LH: loop header
LB: loop body
LE: loop exit
PB: predicated region body
PF: predicated region fallthrough
CT: control target
= control target key end

     0   :  { %s28_s0 = inlined_call_operand.vmem [shape: f32[32], index: 0, kind: input, shape index: {}]   ;;  %s29_s1 = inlined_call_operand.vmem [shape: f32[16,32], index: 1, kind: output, shape index: {}]  }
   0x1   :  { %v4_v0 = vld [vmem:[%s28_s0] ss:$0 sm:$0xff] }
   0x2   :  { %5 = vst [vmem:[%s29_s1] sm:$0xff] %v4_v0 }
   0x3   :  { %8 = vst [vmem:[%s29_s1 + $0x8] sm:$0xff] %v4_v0 }

// kernel: tile.14
= control target key start
LH: loop header
LB: loop body
LE: loop exit
PB: predicated region body
PF: predicated region fallthrough
CT: control target
= control target key end

     0   :  { %s56_s8 = smov 96   ;;  %s57_s11 = smov 32   ;;  %vm3_vm0 = vcmask 261120   ;;  %vm9_vm1 = vcmask 1048320   ;;  %vm15_vm2 = vcmask 785920   ;;  %vm21_vm3 = vcmask 523520   ;;  %s93_s0 = inlined_call_operand.vmem [shape: f32[16,32], index: 0, kind: input, shape index: {}]   ;;  %s94_s1 = inlined_call_operand.vmem [shape: f32[1,1,512], index: 1, kind: output, shape index: {}]  }
   0x1   :  { %v47_v0 = vld [vmem:[%s93_s0 + $0x3] ss:$4 sm:$0xf]   ;;  %v49_v1 = vld [vmem:[%s93_s0 + $0x1] ss:$4 sm:$0xf]  }
   0x2   :  { %7 = vrot.lane.b32.xlu0 %v47_v0, %s56_s8  ;;  %19 = vrot.lane.b32.xlu1 %v49_v1, %s57_s11  ;;  %v48_v2 = vld [vmem:[%s93_s0 + $0x2] ss:$4 sm:$0xf]   ;;  %s58_s14 = smov 64  }
   0x3   :  { %v2_v3 = vld [vmem:[%s93_s0] ss:$4 sm:$0xf]  }
   0x4   :  { %4 = vst.msk [vmem:[#allocation0] ss:$8 sm:$0xf] %vm3_vm0, %v2_v3  }
   0xa   :  { %13 = vrot.lane.b32.xlu0 %v48_v2, %s58_s14 }
  0x74   :  { %v8_v4 = vpop.permute.xlu0 %7   ;;  %v20_v5 = vpop.permute.xlu1 %19  }
  0x75   :  { %10 = vst.msk [vmem:[#allocation0] ss:$8 sm:$0xf] %vm9_vm1, %v8_v4  }
  0x7c   :  { %v14_v6 = vpop.permute.xlu0 %13  }
  0x7d   :  { %16 = vst.msk [vmem:[#allocation0] ss:$8 sm:$0xf] %vm15_vm2, %v14_v6  }
  0x7e   :  { %22 = vst.msk [vmem:[#allocation0] ss:$8 sm:$0xf] %vm21_vm3, %v20_v5  }
  0x85   :  { %v25_v7 = vld [vmem:[#allocation0] sm:$0x1]  ;;  %v30_v8 = vld [vmem:[#allocation0 + $0x8] sm:$0x1]  ;;  %v36_v9 = vld [vmem:[#allocation0 + $0x10] sm:$0x1] }
  0x86   :  { %28 = vst [vmem:[%s94_s1] sm:$0x1] %v25_v7  ;;  %v42_v10 = vld [vmem:[#allocation0 + $0x18] sm:$0x1] }
  0x87   :  { %50 = vst [vmem:[%s94_s1 + $0x1] sm:$0x1] %v30_v8 }
  0x88   :  { %51 = vst [vmem:[%s94_s1 + $0x2] sm:$0x1] %v36_v9 }
  0x89   :  { %52 = vst [vmem:[%s94_s1 + $0x3] sm:$0x1] %v42_v10 }

// kernel: squeeze.57
= control target key start
LH: loop header
LB: loop body
LE: loop exit
PB: predicated region body
PF: predicated region fallthrough
CT: control target
= control target key end

     0   :  { %vm91_vm0 = vcmask 1047556   ;;  %s194_s14 = smov 32   ;;  %s195_s15 = smov 64   ;;  %vm63_vm1 = vcmask 261120   ;;  %s256_s0 = inlined_call_operand.vmem [shape: bf16[1,2,512], index: 0, kind: input, shape index: {}]   ;;  %s257_s1 = inlined_call_operand.vmem [shape: bf16[2,4,4,32], index: 1, kind: output, shape index: {}]  }
   0x1   :  { %v180_v0 = vld [vmem:[%s256_s0 + $0x3] sm:$0x1]  ;;  %v181_v1 = vld [vmem:[%s256_s0 + $0x2] sm:$0x1]  ;;  %v182_v2 = vld [vmem:[%s256_s0 + $0x1] sm:$0x1] }
   0x2   :  { %v15_v3 = vunpack.c.l.bf16 %v180_v0  ;;  %v30_v4 = vunpack.c.l.bf16 %v181_v1  ;;  %v45_v5 = vunpack.c.l.bf16 %v182_v2  ;;  %v58_v6 = vld [vmem:[%s256_s0] sm:$0x1]  ;;  %s193_s0 = smov 96  }
   0x3   :  { %v59_v7 = vunpack.c.l.bf16 %v58_v6 }
   0x4   :  { %18 = vst [vmem:[#allocation1 + $0x18] sm:$0x3] %v15_v3 }
   0x5   :  { %33 = vst [vmem:[#allocation1 + $0x10] sm:$0x3] %v30_v4 }
   0x6   :  { %48 = vst [vmem:[#allocation1 + $0x8] sm:$0x3] %v45_v5 }
   0x7   :  { %61 = vst [vmem:[#allocation1] sm:$0x3] %v59_v7 }
   0xb   :  { %v82_v20 = vld [vmem:[#allocation1 + $0x18] sm:$0x3]  }
   0xc   :  { %v75_v19 = vld [vmem:[#allocation1 + $0x10] sm:$0x3]   ;;  %87 = vst.msk [vmem:[#allocation0 + $0x37] sm:$0x2] %vm63_vm1, %v82_v20  }
   0xd   :  { %v68_v18 = vld [vmem:[#allocation1 + $0x8] sm:$0x3]   ;;  %80 = vst.msk [vmem:[#allocation0 + $0x2f] sm:$0x2] %vm63_vm1, %v75_v19  }
   0xe   :  { %v88_v8 = vld [vmem:[#allocation1] ss:$8 sm:$0xf]   ;;  %v90_v9 = vld [vmem:[#allocation1 - $0x1f] ss:$8 sm:$0xf0]  }
   0xf   :  { %v92_v10 = vsel %vm91_vm0, %v90_v9, %v88_v8  ;;  %v112_v11 = vld [vmem:[#allocation1] ss:$8 sm:$0xf]   ;;  %v114_v12 = vld [vmem:[#allocation1 - $0x1f] ss:$8 sm:$0xf0]  }
  0x10   :  { %93 = vrot.lane.b32.xlu0 %v92_v10, %s193_s0  ;;  %v116_v13 = vsel %vm91_vm0, %v114_v12, %v112_v11  ;;  %v100_v14 = vld [vmem:[#allocation1] ss:$8 sm:$0xf]   ;;  %v102_v15 = vld [vmem:[#allocation1 - $0x1f] ss:$8 sm:$0xf0]  }
  0x11   :  { %117 = vrot.lane.b32.xlu1 %v116_v13, %s194_s14  ;;  %v104_v16 = vsel %vm91_vm0, %v102_v15, %v100_v14  ;;  %v62_v17 = vld [vmem:[#allocation1] sm:$0x3]   ;;  %73 = vst.msk [vmem:[#allocation0 + $0x27] sm:$0x2] %vm63_vm1, %v68_v18  }
  0x12   :  { %66 = vst.msk [vmem:[#allocation0 + $0x1f] sm:$0x2] %vm63_vm1, %v62_v17  }
  0x13   :  { %64 = vst.msk [vmem:[#allocation0] sm:$0x1] %vm63_vm1, %v62_v17  }
  0x14   :  { %71 = vst.msk [vmem:[#allocation0 + $0x8] sm:$0x1] %vm63_vm1, %v68_v18  }
  0x15   :  { %78 = vst.msk [vmem:[#allocation0 + $0x10] sm:$0x1] %vm63_vm1, %v75_v19  }
  0x16   :  { %85 = vst.msk [vmem:[#allocation0 + $0x18] sm:$0x1] %vm63_vm1, %v82_v20  }
  0x18   :  { %105 = vrot.lane.b32.xlu0 %v104_v16, %s195_s15 }
  0x82   :  { %v94_v21 = vpop.permute.xlu0 %93  }
  0x83   :  { %97 = vst.msk [vmem:[#allocation0 + $0x1] ss:$8 sm:$0xf] %vm63_vm1, %v94_v21   ;;  %v118_v22 = vpop.permute.xlu1 %117  }
  0x84   :  { %99 = vst.msk [vmem:[#allocation0 + $0x1] ss:$8 sm:$0xf0] %vm63_vm1, %v94_v21  }
  0x85   :  { %121 = vst.msk [vmem:[#allocation0 + $0x3] ss:$8 sm:$0xf] %vm63_vm1, %v118_v22  }
  0x86   :  { %123 = vst.msk [vmem:[#allocation0 + $0x3] ss:$8 sm:$0xf0] %vm63_vm1, %v118_v22  }
  0x8a   :  { %v106_v23 = vpop.permute.xlu0 %105  }
  0x8b   :  { %109 = vst.msk [vmem:[#allocation0 + $0x2] ss:$8 sm:$0xf] %vm63_vm1, %v106_v23  }
  0x8c   :  { %111 = vst.msk [vmem:[#allocation0 + $0x2] ss:$8 sm:$0xf0] %vm63_vm1, %v106_v23  }
  0x92   :  { %v126_v24 = vld [vmem:[#allocation0] sm:$0xf]  ;;  %v132_v25 = vld [vmem:[#allocation0 + $0x8] sm:$0xf]  ;;  %v139_v26 = vld [vmem:[#allocation0 + $0x10] sm:$0xf] }
  0x93   :  { %v127_v27 = vpack.c.bf16 0.0, %v126_v24  ;;  %v133_v28 = vpack.c.bf16 0.0, %v132_v25  ;;  %v140_v29 = vpack.c.bf16 0.0, %v139_v26  ;;  %v146_v30 = vld [vmem:[#allocation0 + $0x18] sm:$0xf] }
  0x94   :  { %v147_v31 = vpack.c.bf16 0.0, %v146_v30  ;;  %v153_v32 = vld [vmem:[#allocation0 + $0x20] sm:$0xf]  ;;  %v160_v33 = vld [vmem:[#allocation0 + $0x28] sm:$0xf] }
  0x95   :  { %130 = vst [vmem:[%s257_s1] sm:$0x3] %v127_v27  ;;  %v154_v34 = vpack.c.bf16 0.0, %v153_v32  ;;  %v167_v35 = vld [vmem:[#allocation0 + $0x30] sm:$0xf]  ;;  %v161_v36 = vpack.c.bf16 0.0, %v160_v33 }
  0x96   :  { %183 = vst [vmem:[%s257_s1 + $0x2] sm:$0x3] %v133_v28  ;;  %v174_v37 = vld [vmem:[#allocation0 + $0x38] sm:$0xf]  ;;  %v168_v38 = vpack.c.bf16 0.0, %v167_v35 }
  0x97   :  { %184 = vst [vmem:[%s257_s1 + $0x4] sm:$0x3] %v140_v29  ;;  %v175_v39 = vpack.c.bf16 0.0, %v174_v37 }
  0x98   :  { %185 = vst [vmem:[%s257_s1 + $0x6] sm:$0x3] %v147_v31 }
  0x99   :  { %186 = vst [vmem:[%s257_s1 + $0x8] sm:$0x3] %v154_v34 }
  0x9a   :  { %187 = vst [vmem:[%s257_s1 + $0xa] sm:$0x3] %v161_v36 }
  0x9b   :  { %188 = vst [vmem:[%s257_s1 + $0xc] sm:$0x3] %v168_v38 }
  0x9c   :  { %189 = vst [vmem:[%s257_s1 + $0xe] sm:$0x3] %v175_v39 }

// kernel: generator_forward.8
= control target key start
LH: loop header
LB: loop body
LE: loop exit
PB: predicated region body
PF: predicated region fallthrough
CT: control target
= control target key end

     0   :  { %s102_s0 = inlined_call_operand.vmem [shape: f32[1,8,512], index: 0, kind: input, shape index: {}]   ;;  %s103_s1 = inlined_call_operand.vmem [shape: f32[1,1,512], index: 1, kind: input, shape index: {}]   ;;  %s104_s2 = inlined_call_operand.vmem [shape: f32[1,1,512], index: 2, kind: input, shape index: {}]   ;;  %s105_s3 = inlined_call_operand.vmem [shape: bf16[1,8,512], index: 3, kind: output, shape index: {}]  }
   0x1   :  { %v14_v0 = vld [vmem:[%s102_s0] sm:$0xff]  ;;  %v15_v1 = vld [vmem:[%s102_s0 + $0x8] sm:$0xff]  ;;  %v16_v6 = vld [vmem:[%s102_s0 + $0x10] sm:$0xff] }
   0x2   :  { %v18_v2 = vld [vmem:[%s103_s1] sm:$0xf]  ;;  %v17_v7 = vld [vmem:[%s102_s0 + $0x18] sm:$0xff] }
   0x3   :  { %v20_v3 = vperm.slane %v18_v2, 0  ;;  %v21_v4 = vperm.slane %v18_v2, 1  ;;  %v32_v5 = vld [vmem:[%s104_s2] sm:$0xf]  ;;  %v22_v10 = vperm.slane %v18_v2, 2  ;;  %v23_v11 = vperm.slane %v18_v2, 3 }
   0x4   :  { %v34_v8 = vperm.slane %v32_v5, 0  ;;  %v35_v9 = vperm.slane %v32_v5, 1  ;;  %v36_v14 = vperm.slane %v32_v5, 2  ;;  %v37_v15 = vperm.slane %v32_v5, 3 }
   0x5   :  { %v28_v12 = vmul.f32 %v20_v3, %v14_v0  ;;  %v29_v13 = vmul.f32 %v21_v4, %v15_v1  ;;  %v30_v16 = vmul.f32 %v22_v10, %v16_v6  ;;  %v31_v17 = vmul.f32 %v23_v11, %v17_v7 }
   0x7   :  { %v42_v18 = vadd.f32 %v34_v8, %v28_v12  ;;  %v43_v19 = vadd.f32 %v35_v9, %v29_v13  ;;  %v44_v20 = vadd.f32 %v36_v14, %v30_v16  ;;  %v45_v21 = vadd.f32 %v37_v15, %v31_v17 }
   0x9   :  { %v46_v22 = vmax.f32 %v42_v18, 0.0  ;;  %v47_v23 = vmax.f32 %v43_v19, 0.0  ;;  %v48_v24 = vmax.f32 %v44_v20, 0.0  ;;  %v49_v25 = vmax.f32 %v45_v21, 0.0 }
   0xb   :  { %v50_v26 = vpack.c.bf16 %v47_v23, %v46_v22  ;;  %v51_v27 = vpack.c.bf16 %v49_v25, %v48_v24 }
   0xd   :  { %52 = vst [vmem:[%s105_s3] sm:$0xff] %v50_v26 }
   0xe   :  { %53 = vst [vmem:[%s105_s3 + $0x8] sm:$0xff] %v51_v27 }

// kernel: generator_forward.7
= control target key start
LH: loop header
LB: loop body
LE: loop exit
PB: predicated region body
PF: predicated region fallthrough
CT: control target
= control target key end

     0   :  { %vm31_vm0 = vcmask 1043456   ;;  %vm27_vm1 = vcmask 64512   ;;  %vm152_vm2 = vcmask 1040384   ;;  %vm157_vm3 = vcmask 1041408   ;;  %s239_s1 = inlined_call_operand.vmem [shape: bf16[1,8,512], index: 1, kind: input, shape index: {}]   ;;  %s240_s0 = inlined_call_operand.vmem [shape: bf16[1,8,8], index: 0, kind: input, shape index: {}]   ;;  %s241_s2 = inlined_call_operand.vmem [shape: f32[1,8,512], index: 2, kind: output, shape index: {0}]   ;;  %s242_s3 = inlined_call_operand.vmem [shape: f32[1,1,8,512], index: 3, kind: output, shape index: {1}]  }
   0x1   :  { %v15_v0 = vld [vmem:[%s239_s1] sm:$0xff]  ;;  %v16_v1 = vld [vmem:[%s239_s1 + $0x8] sm:$0xff] }
   0x2   :  { %v19_v2 = vunpack.c.l.b16 %v15_v0  ;;  %v20_v3 = vunpack.c.h.b16 %v15_v0  ;;  %v21_v4 = vunpack.c.l.b16 %v16_v1  ;;  %v22_v5 = vunpack.c.h.b16 %v16_v1  ;;  %v14_v14 = vld [vmem:[%s240_s0] sm:$0xf] }
   0x4   :  { %v23_v6 = vpack.c.b16 %v19_v2, %v19_v2  ;;  %v24_v7 = vpack.c.b16 %v20_v3, %v20_v3  ;;  %v25_v8 = vpack.c.b16 %v21_v4, %v21_v4  ;;  %v26_v9 = vpack.c.b16 %v22_v5, %v22_v5 }
   0x6   :  { %v33_v10 = vsel %vm31_vm0, %v23_v6, 0  ;;  %v36_v11 = vsel %vm31_vm0, %v24_v7, 0  ;;  %v39_v12 = vsel %vm31_vm0, %v25_v8, 0  ;;  %v42_v13 = vsel %vm31_vm0, %v26_v9, 0 }
   0x7   :  { %51 = vmatpush.bf16.msra.mxu0 %v33_v10  ;;  %64 = vmatpush.bf16.msra.mxu1 %v36_v11 }
   0x8   :  { %77 = vmatpush.bf16.msra.mxu2 %v39_v12  ;;  %90 = vmatpush.bf16.msra.mxu3 %v42_v13 }
   0xa   :  { %174 = vmatmul.msk.bf16.vlgmr.msra.gmra.mxu0 %vm27_vm1, %v14_v14  ;;  %175 = vmatmul.msk.bf16.vlgmr.msra.gmra.mxu1 %vm27_vm1, %v14_v14 }
   0xb   :  { %176 = vmatmul.msk.bf16.vlgmr.msra.gmra.mxu2 %vm27_vm1, %v14_v14  ;;  %177 = vmatmul.msk.bf16.vlgmr.msra.gmra.mxu3 %vm27_vm1, %v14_v14 }
  0x87   :  { %v53_v15 = vpop.f32.mrf.mxu0  ;;  %v66_v16 = vpop.f32.mrf.mxu1 }
  0x88   :  { %96 = vst [vmem:[%s241_s2] sm:$0xff] %v53_v15  ;;  %v100_v17 = vrot.slane %v53_v15, 4  ;;  %v124_v18 = vmul.f32 %v53_v15, %v53_v15  ;;  %v106_v19 = vrot.slane %v66_v16, 4  ;;  %v125_v20 = vmul.f32 %v66_v16, %v66_v16 }
  0x89   :  { %97 = vst [vmem:[%s241_s2 + $0x8] sm:$0xff] %v66_v16 }
  0x8a   :  { %v101_v21 = vadd.f32 %v100_v17, %v53_v15  ;;  %v128_v22 = vrot.slane %v124_v18, 4  ;;  %v107_v23 = vadd.f32 %v106_v19, %v66_v16  ;;  %v134_v24 = vrot.slane %v125_v20, 4 }
  0x8c   :  { %v102_v25 = vrot.slane %v101_v21, 2  ;;  %v129_v26 = vadd.f32 %v128_v22, %v124_v18  ;;  %v108_v27 = vrot.slane %v107_v23, 2  ;;  %v135_v28 = vadd.f32 %v134_v24, %v125_v20 }
  0x8e   :  { %v103_v29 = vadd.f32 %v102_v25, %v101_v21  ;;  %v130_v30 = vrot.slane %v129_v26, 2  ;;  %v109_v31 = vadd.f32 %v108_v27, %v107_v23  ;;  %v136_v32 = vrot.slane %v135_v28, 2  ;;  %v79_v33 = vpop.f32.mrf.mxu2  ;;  %v92_v34 = vpop.f32.mrf.mxu3 }
  0x8f   :  { %98 = vst [vmem:[%s241_s2 + $0x10] sm:$0xff] %v79_v33  ;;  %v112_v35 = vrot.slane %v79_v33, 4  ;;  %v126_v36 = vmul.f32 %v79_v33, %v79_v33  ;;  %v118_v37 = vrot.slane %v92_v34, 4  ;;  %v127_v38 = vmul.f32 %v92_v34, %v92_v34  ;;  %v55_v39 = vpop.f32.mrf.mxu0  ;;  %v68_v40 = vpop.f32.mrf.mxu1 }
  0x90   :  { %v104_v41 = vrot.slane %v103_v29, 1  ;;  %v131_v42 = vadd.f32 %v130_v30, %v129_v26  ;;  %v110_v43 = vrot.slane %v109_v31, 1  ;;  %v137_v44 = vadd.f32 %v136_v32, %v135_v28  ;;  %99 = vst [vmem:[%s241_s2 + $0x18] sm:$0xff] %v92_v34 }
  0x91   :  { %v113_v45 = vadd.f32 %v112_v35, %v79_v33  ;;  %v140_v46 = vrot.slane %v126_v36, 4  ;;  %v119_v47 = vadd.f32 %v118_v37, %v92_v34  ;;  %v146_v48 = vrot.slane %v127_v38, 4 }
  0x92   :  { %v132_v49 = vrot.slane %v131_v42, 1  ;;  %v138_v50 = vrot.slane %v137_v44, 1  ;;  %v105_v55 = vadd.f32 %v104_v41, %v103_v29  ;;  %v111_v57 = vadd.f32 %v110_v43, %v109_v31 }
  0x93   :  { %v114_v51 = vrot.slane %v113_v45, 2  ;;  %v141_v52 = vadd.f32 %v140_v46, %v126_v36  ;;  %v120_v53 = vrot.slane %v119_v47, 2  ;;  %v147_v54 = vadd.f32 %v146_v48, %v127_v38 }
  0x94   :  { %v133_v56 = vadd.f32 %v132_v49, %v131_v42  ;;  %v139_v58 = vadd.f32 %v138_v50, %v137_v44 }
  0x95   :  { %v115_v59 = vadd.f32 %v114_v51, %v113_v45  ;;  %v142_v60 = vrot.slane %v141_v52, 2  ;;  %v121_v61 = vadd.f32 %v120_v53, %v119_v47  ;;  %v148_v62 = vrot.slane %v147_v54, 2 }
  0x96   :  { %v153_v63 = vsel %vm152_vm2, %v105_v55, %v133_v56  ;;  %v154_v0 = vsel %vm152_vm2, %v111_v57, %v139_v58  ;;  %v81_v1 = vpop.f32.mrf.mxu2  ;;  %v94_v2 = vpop.f32.mrf.mxu3 }
  0x97   :  { %v158_v3 = vsel %vm157_vm3, %v153_v63, 0.0  ;;  %v159_v4 = vsel %vm157_vm3, %v154_v0, 0.0  ;;  %v116_v5 = vrot.slane %v115_v59, 1  ;;  %v143_v6 = vadd.f32 %v142_v60, %v141_v52 }
  0x98   :  { %162 = vst [vmem:[%s242_s3] sm:$0xff] %v158_v3  ;;  %v122_v7 = vrot.slane %v121_v61, 1  ;;  %v149_v8 = vadd.f32 %v148_v62, %v147_v54 }
  0x99   :  { %163 = vst [vmem:[%s242_s3 + $0x8] sm:$0xff] %v159_v4  ;;  %v144_v9 = vrot.slane %v143_v6, 1  ;;  %v117_v11 = vadd.f32 %v116_v5, %v115_v59 }
  0x9a   :  { %v150_v10 = vrot.slane %v149_v8, 1  ;;  %v123_v13 = vadd.f32 %v122_v7, %v121_v61 }
  0x9b   :  { %v145_v12 = vadd.f32 %v144_v9, %v143_v6 }
  0x9c   :  { %v151_v14 = vadd.f32 %v150_v10, %v149_v8 }
  0x9d   :  { %v155_v15 = vsel %vm152_vm2, %v117_v11, %v145_v12 }
  0x9e   :  { %v160_v16 = vsel %vm157_vm3, %v155_v15, 0.0  ;;  %v156_v17 = vsel %vm152_vm2, %v123_v13, %v151_v14 }
  0x9f   :  { %164 = vst [vmem:[%s242_s3 + $0x10] sm:$0xff] %v160_v16  ;;  %v161_v18 = vsel %vm157_vm3, %v156_v17, 0.0 }
  0xa0   :  { %165 = vst [vmem:[%s242_s3 + $0x18] sm:$0xff] %v161_v18 }

// kernel: generator_forward.9
= control target key start
LH: loop header
LB: loop body
LE: loop exit
PB: predicated region body
PF: predicated region fallthrough
CT: control target
= control target key end

     0   :  { %s662_s12 = smov 0   ;;  %s664_s13 = smov 0   ;;  %s707_s0 = inlined_call_operand.vmem [shape: bf16[4,32,128], index: 0, kind: input, shape index: {}]   ;;  %s708_s1 = inlined_call_operand.vmem [shape: bf16[4,128,128], index: 1, kind: input, shape index: {}]   ;;  %s709_s2 = inlined_call_operand.vmem [shape: f32[4,32,128], index: 2, kind: output, shape index: {0}]   ;;  %s710_s3 = inlined_call_operand.vmem [shape: f32[4,1,8,128], index: 3, kind: output, shape index: {1}]  }
   0x1   :  { %s666_s14 = smov 0  }
   0x2 LB: > { %s26_s15 = sadd.s32 1, %s636_s13  ;;  %p523_p0 = scmp.ge.s32.totalorder %s640_s14, 1  ;;  %s640_s14 = sphi %s666_s14, %s14_s14   ;;  %s636_s13 = sphi %s664_s13, %s712_s13   ;;  %s632_s12 = sphi %s662_s12, %s711_s12  }
   0x3   : > { %p28_p1 = scmp.ge.s32.totalorder %s26_s15, 4  ;;  %p173_p2 = scmp.lt.s32.totalorder %s640_s14, 5 }
   0x5   : > { %s714_s15 = smov (%p28_p1, %s26_s15), 0  ;;  %p174_p3 = pnand %p523_p0, %p173_p2 }
   0x6   : > { %p218_p4 = scmp.lt.s32.totalorder (!%p174_p3), %s632_s12, 3 }
   0x7   : > { %177 = sbr.rel (%p174_p3) target bundleno = 204 (0xcc), region = 28 }
   0xc   : > { %s716_s12 = smov (!%p218_p4, %s632_s12), 3  ;;  %vm374_vm0 = vcmask 1040384   ;;  %vm376_vm1 = vcmask 1041408  }
   0xd   : > { %s574_s16 = sshll.u32 %s716_s12, 6  ;;  %s573_s20 = sshll.u32 %s716_s12, 4 }
   0xe   : > { %s231_s19 = scalar_lea.vmem %s708_s1, %s574_s16  ;;  %s225_s23 = scalar_lea.vmem %s707_s0, %s573_s20 }
   0xf   : > { %v585_v0 = vld [vmem:[%s231_s19 + $0x38] sm:$0xff]  ;;  %v584_v1 = vld [vmem:[%s231_s19 + $0x30] sm:$0xff]  ;;  %v583_v2 = vld [vmem:[%s231_s19 + $0x28] sm:$0xff]  ;;  %s575_s24 = sshll.u32 %s716_s12, 5  ;;  %s530_s28 = sshll.u32 %s716_s12, 3 }
  0x10   : > { %329 = vmatpush.bf16.msra.mxu0 %v585_v0  ;;  %586 = vmatpush.bf16.msra.mxu1 %v585_v0  ;;  %v582_v3 = vld [vmem:[%s231_s19 + $0x20] sm:$0xff]  ;;  %v581_v4 = vld [vmem:[%s231_s19 + $0x18] sm:$0xff]  ;;  %v580_v5 = vld [vmem:[%s231_s19 + $0x10] sm:$0xff]  ;;  %s240_s27 = scalar_lea.vmem %s709_s2, %s575_s24  ;;  %s248_s4 = scalar_lea.vmem %s710_s3, %s530_s28 }
  0x11   : > { %v579_v6 = vld [vmem:[%s231_s19 + $0x8] sm:$0xff]  ;;  %v578_v7 = vld [vmem:[%s231_s19] sm:$0xff] }
  0x12   : > { %v576_v8 = vld [vmem:[%s225_s23] sm:$0xff]  ;;  %v577_v9 = vld [vmem:[%s225_s23 + $0x8] sm:$0xff] }
  0x14   : > { %330 = vmatpush.bf16.msra.mxu0 %v584_v1  ;;  %587 = vmatpush.bf16.msra.mxu1 %v584_v1 }
  0x18   : > { %331 = vmatpush.bf16.msra.mxu0 %v583_v2  ;;  %588 = vmatpush.bf16.msra.mxu1 %v583_v2 }
  0x1c   : > { %332 = vmatpush.bf16.msra.mxu0 %v582_v3  ;;  %589 = vmatpush.bf16.msra.mxu1 %v582_v3 }
  0x20   : > { %333 = vmatpush.bf16.msra.mxu0 %v581_v4  ;;  %590 = vmatpush.bf16.msra.mxu1 %v581_v4 }
  0x24   : > { %334 = vmatpush.bf16.msra.mxu0 %v580_v5  ;;  %591 = vmatpush.bf16.msra.mxu1 %v580_v5 }
  0x28   : > { %335 = vmatpush.bf16.msra.mxu0 %v579_v6  ;;  %592 = vmatpush.bf16.msra.mxu1 %v579_v6 }
  0x2c   : > { %336 = vmatpush.bf16.msra.mxu0 %v578_v7  ;;  %593 = vmatpush.bf16.msra.mxu1 %v578_v7 }
  0x2f   : > { %337 = vmatmul.bf16.vlgmr.msra.gmra.mxu0 %v576_v8  ;;  %342 = vmatmul.bf16.vlgmr.msra.gmra.mxu1 %v577_v9 }
  0xac   : > { %v338_v10 = vpop.f32.mrf.mxu0  ;;  %v343_v11 = vpop.f32.mrf.mxu1 }
  0xad   : > { %348 = vst [vmem:[%s240_s27] sm:$0xff] %v338_v10  ;;  %v361_v14 = vmul.f32 %v338_v10, %v338_v10  ;;  %v363_v17 = vmul.f32 %v343_v11, %v343_v11 }
  0xae   : > { %350 = vst [vmem:[%s240_s27 + $0x10] sm:$0xff] %v343_v11 }
  0xb4   : > { %v340_v12 = vpop.f32.mrf.mxu0  ;;  %v345_v13 = vpop.f32.mrf.mxu1 }
  0xb5   : > { %349 = vst [vmem:[%s240_s27 + $0x8] sm:$0xff] %v340_v12  ;;  %v352_v15 = vadd.f32 %v340_v12, %v338_v10  ;;  %v362_v16 = vmul.f32 %v340_v12, %v340_v12  ;;  %v364_v21 = vmul.f32 %v345_v13, %v345_v13 }
  0xb6   : > { %351 = vst [vmem:[%s240_s27 + $0x18] sm:$0xff] %v345_v13 }
  0xb7   : > { %v365_v18 = vadd.f32 %v362_v16, %v361_v14  ;;  %v353_v19 = vadd.f32 %v352_v15, %v343_v11 }
  0xb9   : > { %v354_v20 = vadd.f32 %v353_v19, %v345_v13  ;;  %v366_v22 = vadd.f32 %v365_v18, %v363_v17 }
  0xbb   : > { %v355_v23 = vrot.slane %v354_v20, 4  ;;  %v367_v24 = vadd.f32 %v366_v22, %v364_v21 }
  0xbd   : > { %v356_v25 = vadd.f32 %v355_v23, %v354_v20  ;;  %v368_v26 = vrot.slane %v367_v24, 4 }
  0xbf   : > { %v357_v27 = vrot.slane %v356_v25, 2  ;;  %v369_v28 = vadd.f32 %v368_v26, %v367_v24 }
  0xc1   : > { %v358_v29 = vadd.f32 %v357_v27, %v356_v25  ;;  %v370_v30 = vrot.slane %v369_v28, 2 }
  0xc3   : > { %v359_v31 = vrot.slane %v358_v29, 1  ;;  %v371_v32 = vadd.f32 %v370_v30, %v369_v28 }
  0xc5   : > { %v372_v33 = vrot.slane %v371_v32, 1  ;;  %v360_v34 = vadd.f32 %v359_v31, %v358_v29 }
  0xc7   : > { %v373_v35 = vadd.f32 %v372_v33, %v371_v32 }
  0xc9   : > { %v375_v36 = vsel %vm374_vm0, %v360_v34, %v373_v35 }
  0xca   : > { %v377_v37 = vsel %vm376_vm1, %v375_v36, 0.0 }
  0xcb   : > { %378 = vst [vmem:[%s248_s4] sm:$0xff] %v377_v37 }
  0xcc PF: > { %s14_s14 = sadd.s32 1, %s640_s14   ;;  %s711_s12 = smov %s636_s13 }
  0xcd   : > { %p11_p5 = scmp.ge.s32.totalorder %s14_s14, 6   ;;  %s712_s13 = smov %s714_s15 }
  0xcf   :  { %13 = sbr.rel (!%p11_p5) target bundleno = 2 (0x2), region = 73 }

// kernel: generator_forward.10
= control target key start
LH: loop header
LB: loop body
LE: loop exit
PB: predicated region body
PF: predicated region fallthrough
CT: control target
= control target key end

     0   :  { %s423_s12 = smov 0   ;;  %s425_s13 = smov 0   ;;  %s462_s0 = inlined_call_operand.vmem [shape: f32[4,32,128], index: 0, kind: input, shape index: {}]   ;;  %s463_s1 = inlined_call_operand.vmem [shape: f32[1,1,128], index: 1, kind: input, shape index: {}]   ;;  %s464_s2 = inlined_call_operand.vmem [shape: f32[1,1,128], index: 2, kind: input, shape index: {}]   ;;  %s465_s3 = inlined_call_operand.vmem [shape: bf16[4,32,128], index: 3, kind: output, shape index: {}]  }
   0x1   :  { %s427_s14 = smov 0  }
   0x2 LB: > { %s25_s15 = sadd.s32 1, %s397_s13  ;;  %p333_p0 = scmp.ge.s32.totalorder %s401_s14, 1  ;;  %s401_s14 = sphi %s427_s14, %s13_s14   ;;  %s397_s13 = sphi %s425_s13, %s467_s13   ;;  %s393_s12 = sphi %s423_s12, %s466_s12  }
   0x3   : > { %p27_p1 = scmp.ge.s32.totalorder %s25_s15, 4  ;;  %p158_p2 = scmp.lt.s32.totalorder %s401_s14, 5 }
   0x5   : > { %s469_s15 = smov (%p27_p1, %s25_s15), 0  ;;  %p159_p3 = pnand %p333_p0, %p158_p2 }
   0x6   : > { %p191_p4 = scmp.lt.s32.totalorder (!%p159_p3), %s393_s12, 3 }
   0x7   : > { %162 = sbr.rel (%p159_p3) target bundleno = 26 (0x1a), region = 32 }
   0xc   : > { %s471_s12 = smov (!%p191_p4, %s393_s12), 3  ;;  %v377_v0 = vld [vmem:[%s463_s1] ss:$0 sm:$0xff] }
   0xd   : > { %s340_s18 = sshll.u32 %s471_s12, 5  ;;  %v378_v1 = vld [vmem:[%s464_s2] ss:$0 sm:$0xff]  ;;  %s341_s24 = sshll.u32 %s471_s12, 4 }
   0xe   : > { %s198_s21 = scalar_lea.vmem %s462_s0, %s340_s18  ;;  %s208_s27 = scalar_lea.vmem %s465_s3, %s341_s24 }
   0xf   : > { %v210_v2 = vld [vmem:[%s198_s21] sm:$0xff]  ;;  %v211_v3 = vld [vmem:[%s198_s21 + $0x8] sm:$0xff]  ;;  %v212_v4 = vld [vmem:[%s198_s21 + $0x10] sm:$0xff] }
  0x10   : > { %v218_v5 = vmul.f32 %v377_v0, %v210_v2  ;;  %v219_v6 = vmul.f32 %v377_v0, %v211_v3  ;;  %v213_v7 = vld [vmem:[%s198_s21 + $0x18] sm:$0xff]  ;;  %v220_v8 = vmul.f32 %v377_v0, %v212_v4 }
  0x11   : > { %v221_v9 = vmul.f32 %v377_v0, %v213_v7 }
  0x12   : > { %v226_v10 = vadd.f32 %v378_v1, %v218_v5  ;;  %v227_v11 = vadd.f32 %v378_v1, %v219_v6  ;;  %v228_v12 = vadd.f32 %v378_v1, %v220_v8 }
  0x13   : > { %v229_v13 = vadd.f32 %v378_v1, %v221_v9 }
  0x14   : > { %v230_v14 = vmax.f32 %v226_v10, 0.0  ;;  %v231_v15 = vmax.f32 %v227_v11, 0.0  ;;  %v232_v16 = vmax.f32 %v228_v12, 0.0 }
  0x15   : > { %v233_v17 = vmax.f32 %v229_v13, 0.0 }
  0x16   : > { %v345_v18 = vpack.c.bf16 %v231_v15, %v230_v14 }
  0x17   : > { %v350_v19 = vpack.c.bf16 %v233_v17, %v232_v16 }
  0x18   : > { %346 = vst [vmem:[%s208_s27] sm:$0xff] %v345_v18  }
  0x19   : > { %352 = vst [vmem:[%s208_s27 + $0x8] sm:$0xff] %v350_v19  }
  0x1a PF: > { %s13_s14 = sadd.s32 1, %s401_s14   ;;  %s466_s12 = smov %s397_s13 }
  0x1b   : > { %p10_p5 = scmp.ge.s32.totalorder %s13_s14, 6   ;;  %s467_s13 = smov %s469_s15 }
  0x1d   :  { %12 = sbr.rel (!%p10_p5) target bundleno = 2 (0x2), region = 62 }

// kernel: generator_forward.12
= control target key start
LH: loop header
LB: loop body
LE: loop exit
PB: predicated region body
PF: predicated region fallthrough
CT: control target
= control target key end

     0   :  { %s531_s12 = smov 0   ;;  %s533_s13 = smov 0   ;;  %s638_s0 = inlined_call_operand.vmem [shape: f32[4,128,128], index: 0, kind: input, shape index: {}]   ;;  %s639_s1 = inlined_call_operand.vmem [shape: f32[1,1,128], index: 1, kind: input, shape index: {}]   ;;  %s640_s2 = inlined_call_operand.vmem [shape: f32[1,1,128], index: 2, kind: input, shape index: {}]   ;;  %s641_s3 = inlined_call_operand.vmem [shape: bf16[4,128,128], index: 3, kind: output, shape index: {}]  }
   0x1   :  { %s535_s14 = smov 0  }
   0x2 LB: > { %s25_s15 = sadd.s32 1, %s505_s13  ;;  %p405_p0 = scmp.ge.s32.totalorder %s509_s14, 1  ;;  %s509_s14 = sphi %s535_s14, %s13_s14   ;;  %s505_s13 = sphi %s533_s13, %s643_s13   ;;  %s501_s12 = sphi %s531_s12, %s642_s12  }
   0x3   : > { %p27_p1 = scmp.ge.s32.totalorder %s25_s15, 4  ;;  %p158_p2 = scmp.lt.s32.totalorder %s509_s14, 5 }
   0x5   : > { %s645_s15 = smov (%p27_p1, %s25_s15), 0  ;;  %p159_p3 = pnand %p405_p0, %p158_p2 }
   0x6   : > { %p191_p4 = scmp.lt.s32.totalorder (!%p159_p3), %s501_s12, 3 }
   0x7   : > { %162 = sbr.rel (%p159_p3) target bundleno = 36 (0x24), region = 32 }
   0xc   : > { %s647_s12 = smov (!%p191_p4, %s501_s12), 3  ;;  %v554_v0 = vld [vmem:[%s639_s1] ss:$0 sm:$0xff] }
   0xd   : > { %s412_s18 = sshll.u32 %s647_s12, 7  ;;  %v565_v1 = vld [vmem:[%s640_s2] ss:$0 sm:$0xff]  ;;  %s413_s24 = sshll.u32 %s647_s12, 6 }
   0xe   : > { %s560_s21 = scalar_lea.vmem %s638_s0, %s412_s18  ;;  %s597_s27 = scalar_lea.vmem %s641_s3, %s413_s24 }
   0xf   : > { %v210_v2 = vld [vmem:[%s560_s21] sm:$0xff]  ;;  %v211_v3 = vld [vmem:[%s560_s21 + $0x8] sm:$0xff]  ;;  %v212_v4 = vld [vmem:[%s560_s21 + $0x10] sm:$0xff] }
  0x10   : > { %v230_v5 = vmul.f32 %v554_v0, %v210_v2  ;;  %v231_v6 = vmul.f32 %v554_v0, %v211_v3  ;;  %v213_v7 = vld [vmem:[%s560_s21 + $0x18] sm:$0xff]  ;;  %v232_v8 = vmul.f32 %v554_v0, %v212_v4  ;;  %v214_v9 = vld [vmem:[%s560_s21 + $0x20] sm:$0xff]  ;;  %v215_v10 = vld [vmem:[%s560_s21 + $0x28] sm:$0xff] }
  0x11   : > { %v233_v11 = vmul.f32 %v554_v0, %v213_v7  ;;  %v234_v12 = vmul.f32 %v554_v0, %v214_v9  ;;  %v235_v13 = vmul.f32 %v554_v0, %v215_v10  ;;  %v216_v14 = vld [vmem:[%s560_s21 + $0x30] sm:$0xff]  ;;  %v217_v15 = vld [vmem:[%s560_s21 + $0x38] sm:$0xff]  ;;  %v218_v24 = vld [vmem:[%s560_s21 + $0x40] sm:$0xff] }
  0x12   : > { %v250_v16 = vadd.f32 %v565_v1, %v230_v5  ;;  %v251_v17 = vadd.f32 %v565_v1, %v231_v6  ;;  %v252_v18 = vadd.f32 %v565_v1, %v232_v8  ;;  %v236_v19 = vmul.f32 %v554_v0, %v216_v14  ;;  %v219_v25 = vld [vmem:[%s560_s21 + $0x48] sm:$0xff]  ;;  %v220_v30 = vld [vmem:[%s560_s21 + $0x50] sm:$0xff]  ;;  %v221_v35 = vld [vmem:[%s560_s21 + $0x58] sm:$0xff] }
  0x13   : > { %v253_v20 = vadd.f32 %v565_v1, %v233_v11  ;;  %v254_v21 = vadd.f32 %v565_v1, %v234_v12  ;;  %v255_v22 = vadd.f32 %v565_v1, %v235_v13  ;;  %v237_v23 = vmul.f32 %v554_v0, %v217_v15  ;;  %v222_v36 = vld [vmem:[%s560_s21 + $0x60] sm:$0xff]  ;;  %v223_v41 = vld [vmem:[%s560_s21 + $0x68] sm:$0xff]  ;;  %v224_v42 = vld [vmem:[%s560_s21 + $0x70] sm:$0xff] }
  0x14   : > { %v266_v26 = vmax.f32 %v250_v16, 0.0  ;;  %v267_v27 = vmax.f32 %v251_v17, 0.0  ;;  %v268_v28 = vmax.f32 %v252_v18, 0.0  ;;  %v256_v29 = vadd.f32 %v565_v1, %v236_v19  ;;  %v225_v51 = vld [vmem:[%s560_s21 + $0x78] sm:$0xff] }
  0x15   : > { %v269_v31 = vmax.f32 %v253_v20, 0.0  ;;  %v270_v32 = vmax.f32 %v254_v21, 0.0  ;;  %v271_v33 = vmax.f32 %v255_v22, 0.0  ;;  %v257_v34 = vadd.f32 %v565_v1, %v237_v23 }
  0x16   : > { %v417_v37 = vpack.c.bf16 %v267_v27, %v266_v26  ;;  %v272_v38 = vmax.f32 %v256_v29, 0.0  ;;  %v238_v39 = vmul.f32 %v554_v0, %v218_v24  ;;  %v239_v40 = vmul.f32 %v554_v0, %v219_v25 }
  0x17   : > { %v422_v43 = vpack.c.bf16 %v269_v31, %v268_v28  ;;  %v427_v44 = vpack.c.bf16 %v271_v33, %v270_v32  ;;  %v273_v45 = vmax.f32 %v257_v34, 0.0  ;;  %v240_v46 = vmul.f32 %v554_v0, %v220_v30 }
  0x18   : > { %418 = vst [vmem:[%s597_s27] sm:$0xff] %v417_v37   ;;  %v258_v47 = vadd.f32 %v565_v1, %v238_v39  ;;  %v259_v48 = vadd.f32 %v565_v1, %v239_v40  ;;  %v241_v49 = vmul.f32 %v554_v0, %v221_v35  ;;  %v242_v50 = vmul.f32 %v554_v0, %v222_v36 }
  0x19   : > { %454 = vst [vmem:[%s597_s27 + $0x8] sm:$0xff] %v422_v43   ;;  %v432_v52 = vpack.c.bf16 %v273_v45, %v272_v38  ;;  %v260_v53 = vadd.f32 %v565_v1, %v240_v46  ;;  %v243_v54 = vmul.f32 %v554_v0, %v223_v41  ;;  %v244_v55 = vmul.f32 %v554_v0, %v224_v42 }
  0x1a   : > { %455 = vst [vmem:[%s597_s27 + $0x10] sm:$0xff] %v427_v44   ;;  %v274_v56 = vmax.f32 %v258_v47, 0.0  ;;  %v275_v57 = vmax.f32 %v259_v48, 0.0  ;;  %v261_v58 = vadd.f32 %v565_v1, %v241_v49  ;;  %v262_v59 = vadd.f32 %v565_v1, %v242_v50 }
  0x1b   : > { %456 = vst [vmem:[%s597_s27 + $0x18] sm:$0xff] %v432_v52   ;;  %v276_v60 = vmax.f32 %v260_v53, 0.0  ;;  %v263_v61 = vadd.f32 %v565_v1, %v243_v54  ;;  %v245_v62 = vmul.f32 %v554_v0, %v225_v51  ;;  %v264_v63 = vadd.f32 %v565_v1, %v244_v55 }
  0x1c   : > { %v437_v2 = vpack.c.bf16 %v275_v57, %v274_v56  ;;  %v277_v3 = vmax.f32 %v261_v58, 0.0  ;;  %v278_v4 = vmax.f32 %v262_v59, 0.0 }
  0x1d   : > { %v279_v5 = vmax.f32 %v263_v61, 0.0  ;;  %v265_v6 = vadd.f32 %v565_v1, %v245_v62  ;;  %v280_v7 = vmax.f32 %v264_v63, 0.0 }
  0x1e   : > { %457 = vst [vmem:[%s597_s27 + $0x20] sm:$0xff] %v437_v2   ;;  %v442_v8 = vpack.c.bf16 %v277_v3, %v276_v60 }
  0x1f   : > { %v447_v9 = vpack.c.bf16 %v279_v5, %v278_v4  ;;  %v281_v10 = vmax.f32 %v265_v6, 0.0 }
  0x20   : > { %458 = vst [vmem:[%s597_s27 + $0x28] sm:$0xff] %v442_v8  }
  0x21   : > { %459 = vst [vmem:[%s597_s27 + $0x30] sm:$0xff] %v447_v9   ;;  %v452_v11 = vpack.c.bf16 %v281_v10, %v280_v7 }
  0x23   : > { %460 = vst [vmem:[%s597_s27 + $0x38] sm:$0xff] %v452_v11  }
  0x24 PF: > { %s13_s14 = sadd.s32 1, %s509_s14   ;;  %s642_s12 = smov %s505_s13 }
  0x25   : > { %p10_p5 = scmp.ge.s32.totalorder %s13_s14, 6   ;;  %s643_s13 = smov %s645_s15 }
  0x27   :  { %12 = sbr.rel (!%p10_p5) target bundleno = 2 (0x2), region = 62 }

// kernel: generator_forward.11
= control target key start
LH: loop header
LB: loop body
LE: loop exit
PB: predicated region body
PF: predicated region fallthrough
CT: control target
= control target key end

     0   :  { %s796_s12 = smov 0   ;;  %s798_s13 = smov 0   ;;  %s867_s0 = inlined_call_operand.vmem [shape: bf16[4,128,64], index: 0, kind: input, shape index: {}]   ;;  %s868_s1 = inlined_call_operand.vmem [shape: bf16[4,64,128], index: 1, kind: input, shape index: {}]   ;;  %s869_s2 = inlined_call_operand.vmem [shape: f32[4,128,128], index: 2, kind: output, shape index: {0}]   ;;  %s870_s3 = inlined_call_operand.vmem [shape: f32[4,1,8,128], index: 3, kind: output, shape index: {1}]  }
   0x1   :  { %s800_s14 = smov 0  }
   0x2 LB: > { %s26_s15 = sadd.s32 1, %s770_s13  ;;  %p635_p0 = scmp.ge.s32.totalorder %s774_s14, 1  ;;  %s774_s14 = sphi %s800_s14, %s14_s14   ;;  %s770_s13 = sphi %s798_s13, %s872_s13   ;;  %s766_s12 = sphi %s796_s12, %s871_s12  }
   0x3   : > { %p28_p1 = scmp.ge.s32.totalorder %s26_s15, 4  ;;  %p173_p2 = scmp.lt.s32.totalorder %s774_s14, 5 }
   0x5   : > { %s874_s15 = smov (%p28_p1, %s26_s15), 0  ;;  %p174_p3 = pnand %p635_p0, %p173_p2 }
   0x6   : > { %p218_p4 = scmp.lt.s32.totalorder (!%p174_p3), %s766_s12, 3 }
   0x7   : > { %177 = sbr.rel (%p174_p3) target bundleno = 224 (0xe0), region = 28 }
   0xc   : > { %s876_s12 = smov (!%p218_p4, %s766_s12), 3  ;;  %vm338_vm0 = vcmask 523264   ;;  %vm486_vm1 = vcmask 1040384   ;;  %vm488_vm2 = vcmask 1041408  }
   0xd   : > { %s702_s16 = sshll.u32 %s876_s12, 5  ;;  %s701_s20 = sshll.u32 %s876_s12, 6 }
   0xe   : > { %s231_s19 = scalar_lea.vmem %s868_s1, %s702_s16  ;;  %s225_s23 = scalar_lea.vmem %s867_s0, %s701_s20 }
   0xf   : > { %v715_v0 = vld [vmem:[%s231_s19 + $0x18] sm:$0xff]  ;;  %v714_v1 = vld [vmem:[%s231_s19 + $0x10] sm:$0xff]  ;;  %v713_v2 = vld [vmem:[%s231_s19 + $0x8] sm:$0xff]  ;;  %s703_s24 = sshll.u32 %s876_s12, 7  ;;  %s642_s28 = sshll.u32 %s876_s12, 3 }
  0x10   : > { %367 = vmatpush.bf16.msra.mxu0 %v715_v0  ;;  %716 = vmatpush.bf16.msra.mxu1 %v715_v0  ;;  %v712_v3 = vld [vmem:[%s231_s19] sm:$0xff]  ;;  %v706_v5 = vld [vmem:[%s225_s23 + $0x10] sm:$0xff]  ;;  %v705_v8 = vld [vmem:[%s225_s23 + $0x8] sm:$0xff]  ;;  %s836_s27 = scalar_lea.vmem %s869_s2, %s703_s24  ;;  %s248_s4 = scalar_lea.vmem %s870_s3, %s642_s28 }
  0x11   : > { %717 = vmatpush.bf16.msra.mxu2 %v715_v0  ;;  %718 = vmatpush.bf16.msra.mxu3 %v715_v0  ;;  %v704_v4 = vld [vmem:[%s225_s23] sm:$0xff]  ;;  %v710_v7 = vld [vmem:[%s225_s23 + $0x30] sm:$0xff]  ;;  %v707_v9 = vld [vmem:[%s225_s23 + $0x18] sm:$0xff] }
  0x12   : > { %v708_v6 = vld [vmem:[%s225_s23 + $0x20] sm:$0xff]  ;;  %v709_v10 = vld [vmem:[%s225_s23 + $0x28] sm:$0xff]  ;;  %v711_v11 = vld [vmem:[%s225_s23 + $0x38] sm:$0xff] }
  0x14   : > { %368 = vmatpush.bf16.msra.mxu0 %v714_v1  ;;  %719 = vmatpush.bf16.msra.mxu1 %v714_v1 }
  0x15   : > { %720 = vmatpush.bf16.msra.mxu2 %v714_v1  ;;  %721 = vmatpush.bf16.msra.mxu3 %v714_v1 }
  0x18   : > { %369 = vmatpush.bf16.msra.mxu0 %v713_v2  ;;  %722 = vmatpush.bf16.msra.mxu1 %v713_v2 }
  0x19   : > { %723 = vmatpush.bf16.msra.mxu2 %v713_v2  ;;  %724 = vmatpush.bf16.msra.mxu3 %v713_v2 }
  0x1c   : > { %370 = vmatpush.bf16.msra.mxu0 %v712_v3  ;;  %725 = vmatpush.bf16.msra.mxu1 %v712_v3 }
  0x1d   : > { %726 = vmatpush.bf16.msra.mxu2 %v712_v3  ;;  %727 = vmatpush.bf16.msra.mxu3 %v712_v3 }
  0x1f   : > { %691 = vmatmul.msk.bf16.vlgmr.msra.gmra.mxu0 %vm338_vm0, %v704_v4  ;;  %693 = vmatmul.msk.bf16.vlgmr.msra.gmra.mxu1 %vm338_vm0, %v706_v5 }
  0x20   : > { %695 = vmatmul.msk.bf16.vlgmr.msra.gmra.mxu2 %vm338_vm0, %v708_v6  ;;  %697 = vmatmul.msk.bf16.vlgmr.msra.gmra.mxu3 %vm338_vm0, %v710_v7 }
  0x2f   : > { %692 = vmatmul.msk.bf16.gmra.mxu0 %vm338_vm0, %v705_v8  ;;  %694 = vmatmul.msk.bf16.gmra.mxu1 %vm338_vm0, %v707_v9 }
  0x30   : > { %696 = vmatmul.msk.bf16.gmra.mxu2 %vm338_vm0, %v709_v10  ;;  %698 = vmatmul.msk.bf16.gmra.mxu3 %vm338_vm0, %v711_v11 }
  0x9c   : > { %v372_v12 = vpop.f32.mrf.mxu0  ;;  %v382_v13 = vpop.f32.mrf.mxu1 }
  0x9d   : > { %412 = vst [vmem:[%s836_s27] sm:$0xff] %v372_v12  ;;  %v449_v23 = vmul.f32 %v372_v12, %v372_v12  ;;  %v453_v35 = vmul.f32 %v382_v13, %v382_v13 }
  0x9e   : > { %416 = vst [vmem:[%s836_s27 + $0x20] sm:$0xff] %v382_v13 }
  0xa3   : > { %v392_v14 = vpop.f32.mrf.mxu2  ;;  %v402_v15 = vpop.f32.mrf.mxu3 }
  0xa4   : > { %v374_v16 = vpop.f32.mrf.mxu0  ;;  %v384_v17 = vpop.f32.mrf.mxu1  ;;  %420 = vst [vmem:[%s836_s27 + $0x40] sm:$0xff] %v392_v14  ;;  %v457_v49 = vmul.f32 %v392_v14, %v392_v14  ;;  %v461_v61 = vmul.f32 %v402_v15, %v402_v15 }
  0xa5   : > { %413 = vst [vmem:[%s836_s27 + $0x8] sm:$0xff] %v374_v16  ;;  %v450_v22 = vmul.f32 %v374_v16, %v374_v16  ;;  %v428_v24 = vadd.f32 %v374_v16, %v372_v12  ;;  %v454_v38 = vmul.f32 %v384_v17, %v384_v17 }
  0xa6   : > { %417 = vst [vmem:[%s836_s27 + $0x28] sm:$0xff] %v384_v17 }
  0xa7   : > { %424 = vst [vmem:[%s836_s27 + $0x60] sm:$0xff] %v402_v15  ;;  %v465_v26 = vadd.f32 %v450_v22, %v449_v23 }
  0xab   : > { %v394_v18 = vpop.f32.mrf.mxu2  ;;  %v404_v19 = vpop.f32.mrf.mxu3 }
  0xac   : > { %v377_v20 = vpop.f32.mrf.mxu0  ;;  %v387_v21 = vpop.f32.mrf.mxu1  ;;  %421 = vst [vmem:[%s836_s27 + $0x48] sm:$0xff] %v394_v18  ;;  %v458_v52 = vmul.f32 %v394_v18, %v394_v18  ;;  %v462_v0 = vmul.f32 %v404_v19, %v404_v19 }
  0xad   : > { %414 = vst [vmem:[%s836_s27 + $0x10] sm:$0xff] %v377_v20  ;;  %v451_v25 = vmul.f32 %v377_v20, %v377_v20  ;;  %v429_v27 = vadd.f32 %v428_v24, %v377_v20  ;;  %v455_v41 = vmul.f32 %v387_v21, %v387_v21 }
  0xae   : > { %418 = vst [vmem:[%s836_s27 + $0x30] sm:$0xff] %v387_v21 }
  0xaf   : > { %425 = vst [vmem:[%s836_s27 + $0x68] sm:$0xff] %v404_v19  ;;  %v466_v32 = vadd.f32 %v465_v26, %v451_v25 }
  0xb3   : > { %v397_v28 = vpop.f32.mrf.mxu2  ;;  %v407_v29 = vpop.f32.mrf.mxu3 }
  0xb4   : > { %v379_v30 = vpop.f32.mrf.mxu0  ;;  %v389_v31 = vpop.f32.mrf.mxu1  ;;  %422 = vst [vmem:[%s836_s27 + $0x50] sm:$0xff] %v397_v28  ;;  %v459_v56 = vmul.f32 %v397_v28, %v397_v28  ;;  %v463_v4 = vmul.f32 %v407_v29, %v407_v29 }
  0xb5   : > { %415 = vst [vmem:[%s836_s27 + $0x18] sm:$0xff] %v379_v30  ;;  %v430_v33 = vadd.f32 %v429_v27, %v379_v30  ;;  %v452_v34 = vmul.f32 %v379_v30, %v379_v30  ;;  %v456_v47 = vmul.f32 %v389_v31, %v389_v31 }
  0xb6   : > { %419 = vst [vmem:[%s836_s27 + $0x38] sm:$0xff] %v389_v31 }
  0xb7   : > { %v431_v36 = vadd.f32 %v430_v33, %v382_v13  ;;  %v467_v37 = vadd.f32 %v466_v32, %v452_v34  ;;  %426 = vst [vmem:[%s836_s27 + $0x70] sm:$0xff] %v407_v29 }
  0xb9   : > { %v468_v39 = vadd.f32 %v467_v37, %v453_v35  ;;  %v432_v40 = vadd.f32 %v431_v36, %v384_v17 }
  0xbb   : > { %v433_v42 = vadd.f32 %v432_v40, %v387_v21  ;;  %v469_v43 = vadd.f32 %v468_v39, %v454_v38  ;;  %v399_v44 = vpop.f32.mrf.mxu2  ;;  %v409_v45 = vpop.f32.mrf.mxu3 }
  0xbc   : > { %423 = vst [vmem:[%s836_s27 + $0x58] sm:$0xff] %v399_v44  ;;  %v460_v60 = vmul.f32 %v399_v44, %v399_v44  ;;  %v464_v8 = vmul.f32 %v409_v45, %v409_v45 }
  0xbd   : > { %v434_v46 = vadd.f32 %v433_v42, %v389_v31  ;;  %v470_v48 = vadd.f32 %v469_v43, %v455_v41  ;;  %427 = vst [vmem:[%s836_s27 + $0x78] sm:$0xff] %v409_v45 }
  0xbf   : > { %v435_v50 = vadd.f32 %v434_v46, %v392_v14  ;;  %v471_v51 = vadd.f32 %v470_v48, %v456_v47 }
  0xc1   : > { %v472_v53 = vadd.f32 %v471_v51, %v457_v49  ;;  %v436_v54 = vadd.f32 %v435_v50, %v394_v18 }
  0xc3   : > { %v437_v55 = vadd.f32 %v436_v54, %v397_v28  ;;  %v473_v57 = vadd.f32 %v472_v53, %v458_v52 }
  0xc5   : > { %v474_v58 = vadd.f32 %v473_v57, %v459_v56  ;;  %v438_v59 = vadd.f32 %v437_v55, %v399_v44 }
  0xc7   : > { %v439_v62 = vadd.f32 %v438_v59, %v402_v15  ;;  %v475_v63 = vadd.f32 %v474_v58, %v460_v60 }
  0xc9   : > { %v476_v1 = vadd.f32 %v475_v63, %v461_v61  ;;  %v440_v2 = vadd.f32 %v439_v62, %v404_v19 }
  0xcb   : > { %v441_v3 = vadd.f32 %v440_v2, %v407_v29  ;;  %v477_v5 = vadd.f32 %v476_v1, %v462_v0 }
  0xcd   : > { %v478_v6 = vadd.f32 %v477_v5, %v463_v4  ;;  %v442_v7 = vadd.f32 %v441_v3, %v409_v45 }
  0xcf   : > { %v443_v9 = vrot.slane %v442_v7, 4  ;;  %v479_v10 = vadd.f32 %v478_v6, %v464_v8 }
  0xd1   : > { %v444_v11 = vadd.f32 %v443_v9, %v442_v7  ;;  %v480_v12 = vrot.slane %v479_v10, 4 }
  0xd3   : > { %v445_v13 = vrot.slane %v444_v11, 2  ;;  %v481_v14 = vadd.f32 %v480_v12, %v479_v10 }
  0xd5   : > { %v446_v16 = vadd.f32 %v445_v13, %v444_v11  ;;  %v482_v17 = vrot.slane %v481_v14, 2 }
  0xd7   : > { %v447_v15 = vrot.slane %v446_v16, 1  ;;  %v483_v18 = vadd.f32 %v482_v17, %v481_v14 }
  0xd9   : > { %v484_v20 = vrot.slane %v483_v18, 1  ;;  %v448_v19 = vadd.f32 %v447_v15, %v446_v16 }
  0xdb   : > { %v485_v21 = vadd.f32 %v484_v20, %v483_v18 }
  0xdd   : > { %v487_v22 = vsel %vm486_vm1, %v448_v19, %v485_v21 }
  0xde   : > { %v489_v23 = vsel %vm488_vm2, %v487_v22, 0.0 }
  0xdf   : > { %490 = vst [vmem:[%s248_s4] sm:$0xff] %v489_v23 }
  0xe0 PF: > { %s14_s14 = sadd.s32 1, %s774_s14   ;;  %s871_s12 = smov %s770_s13 }
  0xe1   : > { %p11_p5 = scmp.ge.s32.totalorder %s14_s14, 6   ;;  %s872_s13 = smov %s874_s15 }
  0xe3   :  { %13 = sbr.rel (!%p11_p5) target bundleno = 2 (0x2), region = 73 }

// kernel: generator_forward.13
= control target key start
LH: loop header
LB: loop body
LE: loop exit
PB: predicated region body
PF: predicated region fallthrough
CT: control target
= control target key end

     0   :  { %s1352_s9 = smov 0   ;;  %s1354_s10 = smov 0   ;;  %s1525_s0 = inlined_call_operand.vmem [shape: bf16[4,512,32], index: 0, kind: input, shape index: {}]   ;;  %s1526_s1 = inlined_call_operand.vmem [shape: bf16[4,32,128], index: 1, kind: input, shape index: {}]   ;;  %s1527_s2 = inlined_call_operand.vmem [shape: f32[4,512,128], index: 2, kind: output, shape index: {}]  }
   0x1   :  { %s1356_s11 = smov 0  }
   0x2 LB: > { %s24_s12 = sadd.s32 1, %s1331_s10  ;;  %p941_p0 = scmp.ge.s32.totalorder %s1335_s11, 1  ;;  %s1335_s11 = sphi %s1356_s11, %s12_s11   ;;  %s1331_s10 = sphi %s1354_s10, %s1529_s10   ;;  %s1327_s9 = sphi %s1352_s9, %s1528_s9  }
   0x3   : > { %p26_p1 = scmp.ge.s32.totalorder %s24_s12, 4  ;;  %p143_p2 = scmp.lt.s32.totalorder %s1335_s11, 5 }
   0x5   : > { %s1531_s12 = smov (%p26_p1, %s24_s12), 0  ;;  %p144_p3 = pnand %p941_p0, %p143_p2 }
   0x6   : > { %p179_p4 = scmp.lt.s32.totalorder (!%p144_p3), %s1327_s9, 3 }
   0x7   : > { %147 = sbr.rel (%p144_p3) target bundleno = 285 (0x11d), region = 28 }
   0xc   : > { %s1533_s9 = smov (!%p179_p4, %s1327_s9), 3  ;;  %vm444_vm0 = vcmask 261120  }
   0xd   : > { %s1119_s13 = sshll.u32 %s1533_s9, 4  ;;  %s1118_s14 = sshll.u32 %s1533_s9, 8 }
   0xe   : > { %s192_s17 = scalar_lea.vmem %s1526_s1, %s1119_s13  ;;  %s1380_s20 = scalar_lea.vmem %s1525_s0, %s1118_s14 }
   0xf   : > { %v1154_v0 = vld [vmem:[%s192_s17 + $0x8] sm:$0xff]  ;;  %v1153_v1 = vld [vmem:[%s192_s17] sm:$0xff]  ;;  %v1123_v10 = vld [vmem:[%s1380_s20 + $0x10] sm:$0xff]  ;;  %s1120_s21 = sshll.u32 %s1533_s9, 9 }
  0x10   : > { %547 = vmatpush.bf16.msra.mxu0 %v1154_v0  ;;  %1155 = vmatpush.bf16.msra.mxu1 %v1154_v0  ;;  %v1121_v2 = vld [vmem:[%s1380_s20] sm:$0xff]  ;;  %v1122_v6 = vld [vmem:[%s1380_s20 + $0x8] sm:$0xff]  ;;  %v1131_v11 = vld [vmem:[%s1380_s20 + $0x50] sm:$0xff]  ;;  %s1450_s24 = scalar_lea.vmem %s1527_s2, %s1120_s21 }
  0x11   : > { %1156 = vmatpush.bf16.msra.mxu2 %v1154_v0  ;;  %1157 = vmatpush.bf16.msra.mxu3 %v1154_v0  ;;  %v1129_v3 = vld [vmem:[%s1380_s20 + $0x40] sm:$0xff]  ;;  %v1130_v7 = vld [vmem:[%s1380_s20 + $0x48] sm:$0xff]  ;;  %v1139_v12 = vld [vmem:[%s1380_s20 + $0x90] sm:$0xff] }
  0x12   : > { %v1137_v4 = vld [vmem:[%s1380_s20 + $0x80] sm:$0xff]  ;;  %v1138_v8 = vld [vmem:[%s1380_s20 + $0x88] sm:$0xff]  ;;  %v1147_v13 = vld [vmem:[%s1380_s20 + $0xd0] sm:$0xff] }
  0x13   : > { %v1145_v5 = vld [vmem:[%s1380_s20 + $0xc0] sm:$0xff]  ;;  %v1146_v9 = vld [vmem:[%s1380_s20 + $0xc8] sm:$0xff]  ;;  %v1124_v14 = vld [vmem:[%s1380_s20 + $0x18] sm:$0xff] }
  0x14   : > { %548 = vmatpush.bf16.msra.mxu0 %v1153_v1  ;;  %1158 = vmatpush.bf16.msra.mxu1 %v1153_v1  ;;  %v1132_v15 = vld [vmem:[%s1380_s20 + $0x58] sm:$0xff]  ;;  %v1125_v18 = vld [vmem:[%s1380_s20 + $0x20] sm:$0xff]  ;;  %v1126_v22 = vld [vmem:[%s1380_s20 + $0x28] sm:$0xff] }
  0x15   : > { %1159 = vmatpush.bf16.msra.mxu2 %v1153_v1  ;;  %1160 = vmatpush.bf16.msra.mxu3 %v1153_v1  ;;  %v1140_v16 = vld [vmem:[%s1380_s20 + $0x98] sm:$0xff]  ;;  %v1133_v19 = vld [vmem:[%s1380_s20 + $0x60] sm:$0xff]  ;;  %v1134_v23 = vld [vmem:[%s1380_s20 + $0x68] sm:$0xff] }
  0x16   : > { %v1148_v17 = vld [vmem:[%s1380_s20 + $0xd8] sm:$0xff]  ;;  %v1141_v20 = vld [vmem:[%s1380_s20 + $0xa0] sm:$0xff]  ;;  %v1142_v24 = vld [vmem:[%s1380_s20 + $0xa8] sm:$0xff] }
  0x17   : > { %1084 = vmatmul.msk.bf16.vlgmr.msra.gmra.mxu0 %vm444_vm0, %v1121_v2  ;;  %1092 = vmatmul.msk.bf16.vlgmr.msra.gmra.mxu1 %vm444_vm0, %v1129_v3  ;;  %v1149_v21 = vld [vmem:[%s1380_s20 + $0xe0] sm:$0xff]  ;;  %v1150_v25 = vld [vmem:[%s1380_s20 + $0xe8] sm:$0xff]  ;;  %v1127_v26 = vld [vmem:[%s1380_s20 + $0x30] sm:$0xff] }
  0x18   : > { %1100 = vmatmul.msk.bf16.vlgmr.msra.gmra.mxu2 %vm444_vm0, %v1137_v4  ;;  %1108 = vmatmul.msk.bf16.vlgmr.msra.gmra.mxu3 %vm444_vm0, %v1145_v5  ;;  %v1135_v27 = vld [vmem:[%s1380_s20 + $0x70] sm:$0xff]  ;;  %v1128_v30 = vld [vmem:[%s1380_s20 + $0x38] sm:$0xff] }
  0x19   : > { %v1143_v28 = vld [vmem:[%s1380_s20 + $0xb0] sm:$0xff]  ;;  %v1136_v31 = vld [vmem:[%s1380_s20 + $0x78] sm:$0xff] }
  0x1a   : > { %v1151_v29 = vld [vmem:[%s1380_s20 + $0xf0] sm:$0xff]  ;;  %v1144_v32 = vld [vmem:[%s1380_s20 + $0xb8] sm:$0xff] }
  0x1b   : > { %v1152_v33 = vld [vmem:[%s1380_s20 + $0xf8] sm:$0xff] }
  0x27   : > { %1085 = vmatmul.msk.bf16.gmra.mxu0 %vm444_vm0, %v1122_v6  ;;  %1093 = vmatmul.msk.bf16.gmra.mxu1 %vm444_vm0, %v1130_v7 }
  0x28   : > { %1101 = vmatmul.msk.bf16.gmra.mxu2 %vm444_vm0, %v1138_v8  ;;  %1109 = vmatmul.msk.bf16.gmra.mxu3 %vm444_vm0, %v1146_v9 }
  0x37   : > { %1086 = vmatmul.msk.bf16.gmra.mxu0 %vm444_vm0, %v1123_v10  ;;  %1094 = vmatmul.msk.bf16.gmra.mxu1 %vm444_vm0, %v1131_v11 }
  0x38   : > { %1102 = vmatmul.msk.bf16.gmra.mxu2 %vm444_vm0, %v1139_v12  ;;  %1110 = vmatmul.msk.bf16.gmra.mxu3 %vm444_vm0, %v1147_v13 }
  0x47   : > { %1087 = vmatmul.msk.bf16.gmra.mxu0 %vm444_vm0, %v1124_v14  ;;  %1095 = vmatmul.msk.bf16.gmra.mxu1 %vm444_vm0, %v1132_v15 }
  0x48   : > { %1103 = vmatmul.msk.bf16.gmra.mxu2 %vm444_vm0, %v1140_v16  ;;  %1111 = vmatmul.msk.bf16.gmra.mxu3 %vm444_vm0, %v1148_v17 }
  0x57   : > { %1088 = vmatmul.msk.bf16.gmra.mxu0 %vm444_vm0, %v1125_v18  ;;  %1096 = vmatmul.msk.bf16.gmra.mxu1 %vm444_vm0, %v1133_v19 }
  0x58   : > { %1104 = vmatmul.msk.bf16.gmra.mxu2 %vm444_vm0, %v1141_v20  ;;  %1112 = vmatmul.msk.bf16.gmra.mxu3 %vm444_vm0, %v1149_v21 }
  0x67   : > { %1089 = vmatmul.msk.bf16.gmra.mxu0 %vm444_vm0, %v1126_v22  ;;  %1097 = vmatmul.msk.bf16.gmra.mxu1 %vm444_vm0, %v1134_v23 }
  0x68   : > { %1105 = vmatmul.msk.bf16.gmra.mxu2 %vm444_vm0, %v1142_v24  ;;  %1113 = vmatmul.msk.bf16.gmra.mxu3 %vm444_vm0, %v1150_v25 }
  0x77   : > { %1090 = vmatmul.msk.bf16.gmra.mxu0 %vm444_vm0, %v1127_v26  ;;  %1098 = vmatmul.msk.bf16.gmra.mxu1 %vm444_vm0, %v1135_v27 }
  0x78   : > { %1106 = vmatmul.msk.bf16.gmra.mxu2 %vm444_vm0, %v1143_v28  ;;  %1114 = vmatmul.msk.bf16.gmra.mxu3 %vm444_vm0, %v1151_v29 }
  0x87   : > { %1091 = vmatmul.msk.bf16.gmra.mxu0 %vm444_vm0, %v1128_v30  ;;  %1099 = vmatmul.msk.bf16.gmra.mxu1 %vm444_vm0, %v1136_v31 }
  0x88   : > { %1107 = vmatmul.msk.bf16.gmra.mxu2 %vm444_vm0, %v1144_v32  ;;  %1115 = vmatmul.msk.bf16.gmra.mxu3 %vm444_vm0, %v1152_v33 }
  0x94   : > { %v550_v34 = vpop.f32.mrf.mxu0  ;;  %v590_v35 = vpop.f32.mrf.mxu1 }
  0x95   : > { %1185 = vtanh.f32 %v550_v34 }
  0x96   : > { %1187 = vtanh.f32 %v590_v35 }
  0x9b   : > { %v1186_v36 = vpop.eup %1185  ;;  %v630_v37 = vpop.f32.mrf.mxu2 }
  0x9c   : > { %v670_v38 = vpop.f32.mrf.mxu3  ;;  %v1188_v39 = vpop.eup %1187  ;;  %774 = vst [vmem:[%s1450_s24] sm:$0xff] %v1186_v36  ;;  %1189 = vtanh.f32 %v630_v37 }
  0x9d   : > { %v552_v40 = vpop.f32.mrf.mxu0  ;;  %v592_v41 = vpop.f32.mrf.mxu1  ;;  %790 = vst [vmem:[%s1450_s24 + $0x80] sm:$0xff] %v1188_v39  ;;  %1191 = vtanh.f32 %v670_v38 }
  0x9e   : > { %1193 = vtanh.f32 %v552_v40 }
  0x9f   : > { %1195 = vtanh.f32 %v592_v41 }
  0xa2   : > { %v1190_v42 = vpop.eup %1189 }
  0xa3   : > { %v1192_v43 = vpop.eup %1191  ;;  %806 = vst [vmem:[%s1450_s24 + $0x100] sm:$0xff] %v1190_v42  ;;  %v632_v44 = vpop.f32.mrf.mxu2 }
  0xa4   : > { %v672_v45 = vpop.f32.mrf.mxu3  ;;  %v1194_v46 = vpop.eup %1193  ;;  %822 = vst [vmem:[%s1450_s24 + $0x180] sm:$0xff] %v1192_v43  ;;  %1197 = vtanh.f32 %v632_v44 }
  0xa5   : > { %v555_v47 = vpop.f32.mrf.mxu0  ;;  %v595_v48 = vpop.f32.mrf.mxu1  ;;  %775 = vst [vmem:[%s1450_s24 + $0x8] sm:$0xff] %v1194_v46  ;;  %1199 = vtanh.f32 %v672_v45 }
  0xa6   : > { %v1196_v49 = vpop.eup %1195  ;;  %1201 = vtanh.f32 %v555_v47 }
  0xa7   : > { %791 = vst [vmem:[%s1450_s24 + $0x88] sm:$0xff] %v1196_v49  ;;  %1203 = vtanh.f32 %v595_v48 }
  0xaa   : > { %v1198_v50 = vpop.eup %1197 }
  0xab   : > { %v1200_v51 = vpop.eup %1199  ;;  %807 = vst [vmem:[%s1450_s24 + $0x108] sm:$0xff] %v1198_v50  ;;  %v635_v52 = vpop.f32.mrf.mxu2 }
  0xac   : > { %v675_v53 = vpop.f32.mrf.mxu3  ;;  %v1202_v54 = vpop.eup %1201  ;;  %823 = vst [vmem:[%s1450_s24 + $0x188] sm:$0xff] %v1200_v51  ;;  %1205 = vtanh.f32 %v635_v52 }
  0xad   : > { %v557_v55 = vpop.f32.mrf.mxu0  ;;  %v597_v56 = vpop.f32.mrf.mxu1  ;;  %776 = vst [vmem:[%s1450_s24 + $0x10] sm:$0xff] %v1202_v54  ;;  %1207 = vtanh.f32 %v675_v53 }
  0xae   : > { %v1204_v57 = vpop.eup %1203  ;;  %1209 = vtanh.f32 %v557_v55 }
  0xaf   : > { %792 = vst [vmem:[%s1450_s24 + $0x90] sm:$0xff] %v1204_v57  ;;  %1211 = vtanh.f32 %v597_v56 }
  0xb2   : > { %v1206_v58 = vpop.eup %1205 }
  0xb3   : > { %v1208_v59 = vpop.eup %1207  ;;  %808 = vst [vmem:[%s1450_s24 + $0x110] sm:$0xff] %v1206_v58  ;;  %v637_v60 = vpop.f32.mrf.mxu2 }
  0xb4   : > { %v677_v61 = vpop.f32.mrf.mxu3  ;;  %v1210_v62 = vpop.eup %1209  ;;  %824 = vst [vmem:[%s1450_s24 + $0x190] sm:$0xff] %v1208_v59  ;;  %1213 = vtanh.f32 %v637_v60 }
  0xb5   : > { %v560_v63 = vpop.f32.mrf.mxu0  ;;  %v600_v0 = vpop.f32.mrf.mxu1  ;;  %777 = vst [vmem:[%s1450_s24 + $0x18] sm:$0xff] %v1210_v62  ;;  %1215 = vtanh.f32 %v677_v61 }
  0xb6   : > { %v1212_v1 = vpop.eup %1211  ;;  %1217 = vtanh.f32 %v560_v63 }
  0xb7   : > { %793 = vst [vmem:[%s1450_s24 + $0x98] sm:$0xff] %v1212_v1  ;;  %1219 = vtanh.f32 %v600_v0 }
  0xba   : > { %v1214_v2 = vpop.eup %1213 }
  0xbb   : > { %v1216_v3 = vpop.eup %1215  ;;  %809 = vst [vmem:[%s1450_s24 + $0x118] sm:$0xff] %v1214_v2  ;;  %v640_v4 = vpop.f32.mrf.mxu2 }
  0xbc   : > { %v680_v5 = vpop.f32.mrf.mxu3  ;;  %v1218_v6 = vpop.eup %1217  ;;  %825 = vst [vmem:[%s1450_s24 + $0x198] sm:$0xff] %v1216_v3  ;;  %1221 = vtanh.f32 %v640_v4 }
  0xbd   : > { %v562_v7 = vpop.f32.mrf.mxu0  ;;  %v602_v8 = vpop.f32.mrf.mxu1  ;;  %778 = vst [vmem:[%s1450_s24 + $0x20] sm:$0xff] %v1218_v6  ;;  %1223 = vtanh.f32 %v680_v5 }
  0xbe   : > { %v1220_v9 = vpop.eup %1219  ;;  %1225 = vtanh.f32 %v562_v7 }
  0xbf   : > { %794 = vst [vmem:[%s1450_s24 + $0xa0] sm:$0xff] %v1220_v9  ;;  %1227 = vtanh.f32 %v602_v8 }
  0xc2   : > { %v1222_v10 = vpop.eup %1221 }
  0xc3   : > { %v1224_v11 = vpop.eup %1223  ;;  %810 = vst [vmem:[%s1450_s24 + $0x120] sm:$0xff] %v1222_v10  ;;  %v642_v12 = vpop.f32.mrf.mxu2 }
  0xc4   : > { %v682_v13 = vpop.f32.mrf.mxu3  ;;  %v1226_v14 = vpop.eup %1225  ;;  %826 = vst [vmem:[%s1450_s24 + $0x1a0] sm:$0xff] %v1224_v11  ;;  %1229 = vtanh.f32 %v642_v12 }
  0xc5   : > { %v565_v15 = vpop.f32.mrf.mxu0  ;;  %v605_v16 = vpop.f32.mrf.mxu1  ;;  %779 = vst [vmem:[%s1450_s24 + $0x28] sm:$0xff] %v1226_v14  ;;  %1231 = vtanh.f32 %v682_v13 }
  0xc6   : > { %v1228_v17 = vpop.eup %1227  ;;  %1233 = vtanh.f32 %v565_v15 }
  0xc7   : > { %795 = vst [vmem:[%s1450_s24 + $0xa8] sm:$0xff] %v1228_v17  ;;  %1235 = vtanh.f32 %v605_v16 }
  0xca   : > { %v1230_v18 = vpop.eup %1229 }
  0xcb   : > { %v1232_v19 = vpop.eup %1231  ;;  %811 = vst [vmem:[%s1450_s24 + $0x128] sm:$0xff] %v1230_v18  ;;  %v645_v20 = vpop.f32.mrf.mxu2 }
  0xcc   : > { %v685_v21 = vpop.f32.mrf.mxu3  ;;  %v1234_v22 = vpop.eup %1233  ;;  %827 = vst [vmem:[%s1450_s24 + $0x1a8] sm:$0xff] %v1232_v19  ;;  %1237 = vtanh.f32 %v645_v20 }
  0xcd   : > { %v567_v23 = vpop.f32.mrf.mxu0  ;;  %v607_v24 = vpop.f32.mrf.mxu1  ;;  %780 = vst [vmem:[%s1450_s24 + $0x30] sm:$0xff] %v1234_v22  ;;  %1239 = vtanh.f32 %v685_v21 }
  0xce   : > { %v1236_v25 = vpop.eup %1235  ;;  %1241 = vtanh.f32 %v567_v23 }
  0xcf   : > { %796 = vst [vmem:[%s1450_s24 + $0xb0] sm:$0xff] %v1236_v25  ;;  %1243 = vtanh.f32 %v607_v24 }
  0xd2   : > { %v1238_v26 = vpop.eup %1237 }
  0xd3   : > { %v1240_v27 = vpop.eup %1239  ;;  %812 = vst [vmem:[%s1450_s24 + $0x130] sm:$0xff] %v1238_v26  ;;  %v647_v28 = vpop.f32.mrf.mxu2 }
  0xd4   : > { %v687_v29 = vpop.f32.mrf.mxu3  ;;  %v1242_v30 = vpop.eup %1241  ;;  %828 = vst [vmem:[%s1450_s24 + $0x1b0] sm:$0xff] %v1240_v27  ;;  %1245 = vtanh.f32 %v647_v28 }
  0xd5   : > { %v570_v31 = vpop.f32.mrf.mxu0  ;;  %v610_v32 = vpop.f32.mrf.mxu1  ;;  %781 = vst [vmem:[%s1450_s24 + $0x38] sm:$0xff] %v1242_v30  ;;  %1247 = vtanh.f32 %v687_v29 }
  0xd6   : > { %v1244_v33 = vpop.eup %1243  ;;  %1249 = vtanh.f32 %v570_v31 }
  0xd7   : > { %797 = vst [vmem:[%s1450_s24 + $0xb8] sm:$0xff] %v1244_v33  ;;  %1251 = vtanh.f32 %v610_v32 }
  0xda   : > { %v1246_v34 = vpop.eup %1245 }
  0xdb   : > { %v1248_v35 = vpop.eup %1247  ;;  %813 = vst [vmem:[%s1450_s24 + $0x138] sm:$0xff] %v1246_v34  ;;  %v650_v36 = vpop.f32.mrf.mxu2 }
  0xdc   : > { %v690_v37 = vpop.f32.mrf.mxu3  ;;  %v1250_v38 = vpop.eup %1249  ;;  %829 = vst [vmem:[%s1450_s24 + $0x1b8] sm:$0xff] %v1248_v35  ;;  %1253 = vtanh.f32 %v650_v36 }
  0xdd   : > { %v572_v39 = vpop.f32.mrf.mxu0  ;;  %v612_v40 = vpop.f32.mrf.mxu1  ;;  %782 = vst [vmem:[%s1450_s24 + $0x40] sm:$0xff] %v1250_v38  ;;  %1255 = vtanh.f32 %v690_v37 }
  0xde   : > { %v1252_v41 = vpop.eup %1251  ;;  %1257 = vtanh.f32 %v572_v39 }
  0xdf   : > { %798 = vst [vmem:[%s1450_s24 + $0xc0] sm:$0xff] %v1252_v41  ;;  %1259 = vtanh.f32 %v612_v40 }
  0xe2   : > { %v1254_v42 = vpop.eup %1253 }
  0xe3   : > { %v1256_v43 = vpop.eup %1255  ;;  %814 = vst [vmem:[%s1450_s24 + $0x140] sm:$0xff] %v1254_v42  ;;  %v652_v44 = vpop.f32.mrf.mxu2 }
  0xe4   : > { %v692_v45 = vpop.f32.mrf.mxu3  ;;  %v1258_v46 = vpop.eup %1257  ;;  %830 = vst [vmem:[%s1450_s24 + $0x1c0] sm:$0xff] %v1256_v43  ;;  %1261 = vtanh.f32 %v652_v44 }
  0xe5   : > { %v575_v47 = vpop.f32.mrf.mxu0  ;;  %v615_v48 = vpop.f32.mrf.mxu1  ;;  %783 = vst [vmem:[%s1450_s24 + $0x48] sm:$0xff] %v1258_v46  ;;  %1263 = vtanh.f32 %v692_v45 }
  0xe6   : > { %v1260_v49 = vpop.eup %1259  ;;  %1265 = vtanh.f32 %v575_v47 }
  0xe7   : > { %799 = vst [vmem:[%s1450_s24 + $0xc8] sm:$0xff] %v1260_v49  ;;  %1267 = vtanh.f32 %v615_v48 }
  0xea   : > { %v1262_v50 = vpop.eup %1261 }
  0xeb   : > { %v1264_v51 = vpop.eup %1263  ;;  %815 = vst [vmem:[%s1450_s24 + $0x148] sm:$0xff] %v1262_v50  ;;  %v655_v52 = vpop.f32.mrf.mxu2 }
  0xec   : > { %v695_v53 = vpop.f32.mrf.mxu3  ;;  %v1266_v54 = vpop.eup %1265  ;;  %831 = vst [vmem:[%s1450_s24 + $0x1c8] sm:$0xff] %v1264_v51  ;;  %1269 = vtanh.f32 %v655_v52 }
  0xed   : > { %v577_v55 = vpop.f32.mrf.mxu0  ;;  %v617_v56 = vpop.f32.mrf.mxu1  ;;  %784 = vst [vmem:[%s1450_s24 + $0x50] sm:$0xff] %v1266_v54  ;;  %1271 = vtanh.f32 %v695_v53 }
  0xee   : > { %v1268_v57 = vpop.eup %1267  ;;  %1273 = vtanh.f32 %v577_v55 }
  0xef   : > { %800 = vst [vmem:[%s1450_s24 + $0xd0] sm:$0xff] %v1268_v57  ;;  %1275 = vtanh.f32 %v617_v56 }
  0xf2   : > { %v1270_v58 = vpop.eup %1269 }
  0xf3   : > { %v1272_v59 = vpop.eup %1271  ;;  %816 = vst [vmem:[%s1450_s24 + $0x150] sm:$0xff] %v1270_v58  ;;  %v657_v60 = vpop.f32.mrf.mxu2 }
  0xf4   : > { %v697_v61 = vpop.f32.mrf.mxu3  ;;  %v1274_v62 = vpop.eup %1273  ;;  %832 = vst [vmem:[%s1450_s24 + $0x1d0] sm:$0xff] %v1272_v59  ;;  %1277 = vtanh.f32 %v657_v60 }
  0xf5   : > { %v580_v63 = vpop.f32.mrf.mxu0  ;;  %v620_v0 = vpop.f32.mrf.mxu1  ;;  %785 = vst [vmem:[%s1450_s24 + $0x58] sm:$0xff] %v1274_v62  ;;  %1279 = vtanh.f32 %v697_v61 }
  0xf6   : > { %v1276_v1 = vpop.eup %1275  ;;  %1281 = vtanh.f32 %v580_v63 }
  0xf7   : > { %801 = vst [vmem:[%s1450_s24 + $0xd8] sm:$0xff] %v1276_v1  ;;  %1283 = vtanh.f32 %v620_v0 }
  0xfa   : > { %v1278_v2 = vpop.eup %1277 }
  0xfb   : > { %v1280_v3 = vpop.eup %1279  ;;  %817 = vst [vmem:[%s1450_s24 + $0x158] sm:$0xff] %v1278_v2  ;;  %v660_v4 = vpop.f32.mrf.mxu2 }
  0xfc   : > { %v700_v5 = vpop.f32.mrf.mxu3  ;;  %v1282_v6 = vpop.eup %1281  ;;  %833 = vst [vmem:[%s1450_s24 + $0x1d8] sm:$0xff] %v1280_v3  ;;  %1285 = vtanh.f32 %v660_v4 }
  0xfd   : > { %v582_v7 = vpop.f32.mrf.mxu0  ;;  %v622_v8 = vpop.f32.mrf.mxu1  ;;  %786 = vst [vmem:[%s1450_s24 + $0x60] sm:$0xff] %v1282_v6  ;;  %1287 = vtanh.f32 %v700_v5 }
  0xfe   : > { %v1284_v9 = vpop.eup %1283  ;;  %1289 = vtanh.f32 %v582_v7 }
  0xff   : > { %802 = vst [vmem:[%s1450_s24 + $0xe0] sm:$0xff] %v1284_v9  ;;  %1291 = vtanh.f32 %v622_v8 }
 0x102   : > { %v1286_v10 = vpop.eup %1285 }
 0x103   : > { %v1288_v11 = vpop.eup %1287  ;;  %818 = vst [vmem:[%s1450_s24 + $0x160] sm:$0xff] %v1286_v10  ;;  %v662_v12 = vpop.f32.mrf.mxu2 }
 0x104   : > { %v702_v13 = vpop.f32.mrf.mxu3  ;;  %v1290_v14 = vpop.eup %1289  ;;  %834 = vst [vmem:[%s1450_s24 + $0x1e0] sm:$0xff] %v1288_v11  ;;  %1293 = vtanh.f32 %v662_v12 }
 0x105   : > { %v585_v15 = vpop.f32.mrf.mxu0  ;;  %v625_v16 = vpop.f32.mrf.mxu1  ;;  %787 = vst [vmem:[%s1450_s24 + $0x68] sm:$0xff] %v1290_v14  ;;  %1295 = vtanh.f32 %v702_v13 }
 0x106   : > { %v1292_v17 = vpop.eup %1291  ;;  %1297 = vtanh.f32 %v585_v15 }
 0x107   : > { %803 = vst [vmem:[%s1450_s24 + $0xe8] sm:$0xff] %v1292_v17  ;;  %1299 = vtanh.f32 %v625_v16 }
 0x10a   : > { %v1294_v18 = vpop.eup %1293 }
 0x10b   : > { %v1296_v19 = vpop.eup %1295  ;;  %819 = vst [vmem:[%s1450_s24 + $0x168] sm:$0xff] %v1294_v18  ;;  %v665_v20 = vpop.f32.mrf.mxu2 }
 0x10c   : > { %v705_v21 = vpop.f32.mrf.mxu3  ;;  %v1298_v22 = vpop.eup %1297  ;;  %835 = vst [vmem:[%s1450_s24 + $0x1e8] sm:$0xff] %v1296_v19  ;;  %1301 = vtanh.f32 %v665_v20 }
 0x10d   : > { %v587_v23 = vpop.f32.mrf.mxu0  ;;  %v627_v24 = vpop.f32.mrf.mxu1  ;;  %788 = vst [vmem:[%s1450_s24 + $0x70] sm:$0xff] %v1298_v22  ;;  %1303 = vtanh.f32 %v705_v21 }
 0x10e   : > { %v1300_v25 = vpop.eup %1299  ;;  %1305 = vtanh.f32 %v587_v23 }
 0x10f   : > { %804 = vst [vmem:[%s1450_s24 + $0xf0] sm:$0xff] %v1300_v25  ;;  %1307 = vtanh.f32 %v627_v24 }
 0x112   : > { %v1302_v26 = vpop.eup %1301 }
 0x113   : > { %v1304_v27 = vpop.eup %1303  ;;  %820 = vst [vmem:[%s1450_s24 + $0x170] sm:$0xff] %v1302_v26  ;;  %v667_v28 = vpop.f32.mrf.mxu2 }
 0x114   : > { %v707_v29 = vpop.f32.mrf.mxu3  ;;  %v1306_v30 = vpop.eup %1305  ;;  %836 = vst [vmem:[%s1450_s24 + $0x1f0] sm:$0xff] %v1304_v27  ;;  %1309 = vtanh.f32 %v667_v28 }
 0x115   : > { %v1308_v31 = vpop.eup %1307  ;;  %789 = vst [vmem:[%s1450_s24 + $0x78] sm:$0xff] %v1306_v30  ;;  %1311 = vtanh.f32 %v707_v29 }
 0x116   : > { %805 = vst [vmem:[%s1450_s24 + $0xf8] sm:$0xff] %v1308_v31 }
 0x11a   : > { %v1310_v32 = vpop.eup %1309 }
 0x11b   : > { %v1312_v33 = vpop.eup %1311  ;;  %821 = vst [vmem:[%s1450_s24 + $0x178] sm:$0xff] %v1310_v32 }
 0x11c   : > { %837 = vst [vmem:[%s1450_s24 + $0x1f8] sm:$0xff] %v1312_v33 }
 0x11d PF: > { %s12_s11 = sadd.s32 1, %s1335_s11   ;;  %s1528_s9 = smov %s1331_s10 }
 0x11e   : > { %p9_p5 = scmp.ge.s32.totalorder %s12_s11, 6   ;;  %s1529_s10 = smov %s1531_s12 }
 0x120   :  { %11 = sbr.rel (!%p9_p5) target bundleno = 2 (0x2), region = 61 }

</bundles_post_ra>
